<compile_context>
chip_gen: v6e
topology: v6e:2x2x1
jax: 0.10.0
libtpu: 0.0.40
codegen_flags: <defaults>
</compile_context>

<pallas_src>
import math

import jax
import jax.numpy as jnp
from jax.experimental import pallas as pl
from jax.experimental.pallas import tpu as pltpu


def _make_kernel(G: int, M: int, D: int):
    """Build the kernel body for a given (G nodes/row, M meta-paths, D feats)."""

    def kernel(z_ref, w1_ref, b1_ref, w2_ref, o_ref):
        # z_ref : (R, G*M*D)  lane-dense slab; row r holds G nodes, each (M, D)
        # w1_ref: (D, H)      first Linear weight (right-matmul layout)
        # b1_ref: (1, H)      first Linear bias
        # w2_ref: (1, H)      second Linear weight as a row (no bias)
        # o_ref : (R, G*D)    lane-dense output slab
        w1 = w1_ref[...].astype(jnp.float32)
        b1 = b1_ref[...].astype(jnp.float32)
        w2 = w2_ref[...].astype(jnp.float32)

        for g in range(G):                      # static, small unrolled loop
            base = g * M * D

            # --- attention scores for the M meta-paths of node sub-group g ---
            scores = []
            for m in range(M):
                zgm = z_ref[:, base + m * D: base + (m + 1) * D]
                zgm = zgm.astype(jnp.float32)                     # (R, D)
                h = jnp.tanh(
                    jnp.dot(zgm, w1, preferred_element_type=jnp.float32) + b1
                )                                                 # (R, H)
                # (H,1) projection as VPU mul + lane reduction (no 1-lane MXU op)
                scores.append(jnp.sum(h * w2, axis=-1, keepdims=True))  # (R, 1)

            # --- softmax over the meta-path axis (dim=1 in PyTorch) ---
            smax = scores[0]
            for s in scores[1:]:
                smax = jnp.maximum(smax, s)
            exps = [jnp.exp(s - smax) for s in scores]
            denom = exps[0]
            for e in exps[1:]:
                denom = denom + e
            inv = 1.0 / denom                                      # (R, 1)

            # --- weighted sum over meta-paths ---
            out_g = None
            for m in range(M):
                zgm = z_ref[:, base + m * D: base + (m + 1) * D]
                zgm = zgm.astype(jnp.float32)                      # (R, D)
                c = (exps[m] * inv) * zgm
                out_g = c if out_g is None else out_g + c

            o_ref[:, g * D:(g + 1) * D] = out_g.astype(o_ref.dtype)

    return kernel


def semantic_attention(z, w1, b1, w2, *, vmem_budget_bytes=24 * 1024 * 1024):
    """z: (N, M, D); w1: (D, H); b1: (H,); w2: (H, 1) -> (N, D)."""
    N, M, D = z.shape
    H = w1.shape[1]
    itemsize = jnp.dtype(z.dtype).itemsize

    # Pack G consecutive nodes per kernel row so that G*D (output lane width)
    # is a multiple of 128 -> dense vregs / DMA / stores.  Fall back to G=1 if
    # that would make a single row absurdly wide.
    G = 128 // math.gcd(D, 128)
    if G * M * D * itemsize > (256 << 10):
        G = 1  # TODO(synk): exotic D; accept partially-masked stores instead.

    z_row_elems = G * M * D
    out_row_elems = G * D
    z_row_bytes = z_row_elems * itemsize
    out_row_bytes = out_row_elems * itemsize

    rows = pl.cdiv(N, G)

    # Tile sizing: ~2 MiB z-block target, capped by a VMEM budget that stays
    # comfortable on v7x (64 MiB physical), while keeping >= ~8 grid steps so
    # both v7x TensorCores get work and the pipeline warms up.
    budget_rows = max(8, vmem_budget_bytes // (2 * (z_row_bytes + out_row_bytes)))
    target_rows = max(8, (2 << 20) // z_row_bytes)
    tile_rows = min(budget_rows, target_rows)
    tile_rows = min(tile_rows, max(32, pl.cdiv(rows, 8)))
    tile_rows = max(8, (tile_rows // 8) * 8)

    rows_pad = pl.cdiv(rows, tile_rows) * tile_rows
    n_pad = rows_pad * G
    if n_pad != N:
        # Zero padding is safe: padded rows get finite scores and zero output,
        # and are sliced off below.
        z = jnp.pad(z, ((0, n_pad - N), (0, 0), (0, 0)))

    z2d = z.reshape(rows_pad, z_row_elems)        # contiguous -> free reshape
    b1_2d = b1.reshape(1, H)
    w2_row = w2.reshape(1, H)                     # (H, 1) -> (1, H)

    kernel = _make_kernel(G, M, D)

    out2d = pl.pallas_call(
        kernel,
        out_shape=jax.ShapeDtypeStruct((rows_pad, out_row_elems), z.dtype),
        grid_spec=pltpu.PrefetchScalarGridSpec(
            num_scalar_prefetch=0,
            grid=(rows_pad // tile_rows,),
            in_specs=[
                pl.BlockSpec((tile_rows, z_row_elems), lambda i: (i, 0)),
                pl.BlockSpec((D, H), lambda i: (0, 0)),
                pl.BlockSpec((1, H), lambda i: (0, 0)),
                pl.BlockSpec((1, H), lambda i: (0, 0)),
            ],
            out_specs=pl.BlockSpec((tile_rows, out_row_elems), lambda i: (i, 0)),
        ),
        compiler_params=pltpu.CompilerParams(
            dimension_semantics=("parallel",),
            vmem_limit_bytes=32 * 1024 * 1024,
        ),
    )(z2d, w1, b1_2d, w2_row)

    return out2d.reshape(rows_pad * G, D)[:N]


def semantic_attention_ref(z, w1, b1, w2):
    """Pure-JAX reference mirroring the PyTorch module."""
    w = jnp.tanh(jnp.einsum("nmd,dh->nmh", z, w1) + b1) @ w2   # (N, M, 1)
    beta = jax.nn.softmax(w, axis=1)                            # (N, M, 1)
    return jnp.sum(beta * z, axis=1)                            # (N, D)


if __name__ == "__main__":
    # N nodes, M meta-paths, D features, H hidden (module default is 128;
    # kept small here for a quick self-check).
    N, M, D, H = 1024, 4, 32, 32
    key = jax.random.PRNGKey(0)
    kz, kw1, kb1, kw2 = jax.random.split(key, 4)

    z = jax.random.normal(kz, (N, M, D), dtype=jnp.float32)
    # Deterministic parameter init (stand-in for nn.Linear defaults).
    w1 = jax.random.normal(kw1, (D, H), dtype=jnp.float32) * (1.0 / jnp.sqrt(D))
    b1 = jax.random.normal(kb1, (H,), dtype=jnp.float32) * 0.01
    w2 = jax.random.normal(kw2, (H, 1), dtype=jnp.float32) * (1.0 / jnp.sqrt(H))

    out = semantic_attention(z, w1, b1, w2)
    out = jax.block_until_ready(out)

    ref = semantic_attention_ref(z, w1, b1, w2)
    assert out.shape == (N, D)
    assert jnp.allclose(out, ref, atol=2e-5, rtol=2e-5), "mismatch vs reference"

    print("KERNEL_OK")
</pallas_src>

<mosaic_0001>
module attributes {stable_mosaic.version = 11 : i64} {
  func.func @kernel(%arg0: i32, %arg1: memref<32x512xf32, #tpu.memory_space<vmem>>, %arg2: memref<32x32xf32, #tpu.memory_space<vmem>>, %arg3: memref<1x32xf32, #tpu.memory_space<vmem>>, %arg4: memref<1x32xf32, #tpu.memory_space<vmem>>, %arg5: memref<32x128xf32, #tpu.memory_space<vmem>>) attributes {dimension_semantics = [#tpu.dimension_semantics<parallel>], iteration_bounds = array<i64: 8>, scalar_prefetch = 0 : i64, scratch_operands = 0 : i64, tpu.core_type = #tpu.core_type<tc>, window_params = [{transform_indices = @transform_0, window_bounds = array<i64: 32, 512>}, {pipeline_mode = #tpu.pipeline_mode<synchronous>, transform_indices = @transform_1, window_bounds = array<i64: 32, 32>}, {pipeline_mode = #tpu.pipeline_mode<synchronous>, transform_indices = @transform_2, window_bounds = array<i64: 1, 32>}, {pipeline_mode = #tpu.pipeline_mode<synchronous>, transform_indices = @transform_3, window_bounds = array<i64: 1, 32>}, {transform_indices = @transform_4, window_bounds = array<i64: 32, 128>}]} {
    %c0 = arith.constant 0 : index
    %c0_0 = arith.constant 0 : index
    %0 = vector.load %arg2[%c0, %c0_0] : memref<32x32xf32, #tpu.memory_space<vmem>>, vector<32x32xf32>
    %c0_1 = arith.constant 0 : index
    %c0_2 = arith.constant 0 : index
    %1 = vector.load %arg3[%c0_1, %c0_2] : memref<1x32xf32, #tpu.memory_space<vmem>>, vector<1x32xf32>
    %c0_3 = arith.constant 0 : index
    %c0_4 = arith.constant 0 : index
    %2 = vector.load %arg4[%c0_3, %c0_4] : memref<1x32xf32, #tpu.memory_space<vmem>>, vector<1x32xf32>
    %c0_5 = arith.constant 0 : index
    %c0_6 = arith.constant 0 : index
    %3 = vector.load %arg1[%c0_5, %c0_6] : memref<32x512xf32, #tpu.memory_space<vmem>>, vector<32x32xf32>
    %cst = arith.constant dense<0.000000e+00> : vector<32x32xf32>
    %4 = tpu.matmul %3, %0, %cst {dimension_numbers = #tpu.dot_dimension_numbers<[1], [0], [0], [1], [0, 0, 1, 1], [], []>} : vector<32x32xf32>, vector<32x32xf32>, vector<32x32xf32> -> vector<32x32xf32>
    %5 = vector.broadcast %1 : vector<1x32xf32> to vector<32x32xf32>
    %6 = arith.addf %4, %5 : vector<32x32xf32>
    %7 = math.tanh %6 : vector<32x32xf32>
    %8 = vector.broadcast %2 : vector<1x32xf32> to vector<32x32xf32>
    %9 = arith.mulf %7, %8 : vector<32x32xf32>
    %cst_7 = arith.constant dense<0.000000e+00> : vector<32xf32>
    %10 = vector.multi_reduction <add>, %9, %cst_7 [1] : vector<32x32xf32> to vector<32xf32>
    %11 = vector.shape_cast %10 : vector<32xf32> to vector<32x1xf32>
    %c0_8 = arith.constant 0 : index
    %c32 = arith.constant 32 : index
    %12 = vector.load %arg1[%c0_8, %c32] : memref<32x512xf32, #tpu.memory_space<vmem>>, vector<32x32xf32>
    %cst_9 = arith.constant dense<0.000000e+00> : vector<32x32xf32>
    %13 = tpu.matmul %12, %0, %cst_9 {dimension_numbers = #tpu.dot_dimension_numbers<[1], [0], [0], [1], [0, 0, 1, 1], [], []>} : vector<32x32xf32>, vector<32x32xf32>, vector<32x32xf32> -> vector<32x32xf32>
    %14 = vector.broadcast %1 : vector<1x32xf32> to vector<32x32xf32>
    %15 = arith.addf %13, %14 : vector<32x32xf32>
    %16 = math.tanh %15 : vector<32x32xf32>
    %17 = vector.broadcast %2 : vector<1x32xf32> to vector<32x32xf32>
    %18 = arith.mulf %16, %17 : vector<32x32xf32>
    %cst_10 = arith.constant dense<0.000000e+00> : vector<32xf32>
    %19 = vector.multi_reduction <add>, %18, %cst_10 [1] : vector<32x32xf32> to vector<32xf32>
    %20 = vector.shape_cast %19 : vector<32xf32> to vector<32x1xf32>
    %c0_11 = arith.constant 0 : index
    %c64 = arith.constant 64 : index
    %21 = vector.load %arg1[%c0_11, %c64] : memref<32x512xf32, #tpu.memory_space<vmem>>, vector<32x32xf32>
    %cst_12 = arith.constant dense<0.000000e+00> : vector<32x32xf32>
    %22 = tpu.matmul %21, %0, %cst_12 {dimension_numbers = #tpu.dot_dimension_numbers<[1], [0], [0], [1], [0, 0, 1, 1], [], []>} : vector<32x32xf32>, vector<32x32xf32>, vector<32x32xf32> -> vector<32x32xf32>
    %23 = vector.broadcast %1 : vector<1x32xf32> to vector<32x32xf32>
    %24 = arith.addf %22, %23 : vector<32x32xf32>
    %25 = math.tanh %24 : vector<32x32xf32>
    %26 = vector.broadcast %2 : vector<1x32xf32> to vector<32x32xf32>
    %27 = arith.mulf %25, %26 : vector<32x32xf32>
    %cst_13 = arith.constant dense<0.000000e+00> : vector<32xf32>
    %28 = vector.multi_reduction <add>, %27, %cst_13 [1] : vector<32x32xf32> to vector<32xf32>
    %29 = vector.shape_cast %28 : vector<32xf32> to vector<32x1xf32>
    %c0_14 = arith.constant 0 : index
    %c96 = arith.constant 96 : index
    %30 = vector.load %arg1[%c0_14, %c96] : memref<32x512xf32, #tpu.memory_space<vmem>>, vector<32x32xf32>
    %cst_15 = arith.constant dense<0.000000e+00> : vector<32x32xf32>
    %31 = tpu.matmul %30, %0, %cst_15 {dimension_numbers = #tpu.dot_dimension_numbers<[1], [0], [0], [1], [0, 0, 1, 1], [], []>} : vector<32x32xf32>, vector<32x32xf32>, vector<32x32xf32> -> vector<32x32xf32>
    %32 = vector.broadcast %1 : vector<1x32xf32> to vector<32x32xf32>
    %33 = arith.addf %31, %32 : vector<32x32xf32>
    %34 = math.tanh %33 : vector<32x32xf32>
    %35 = vector.broadcast %2 : vector<1x32xf32> to vector<32x32xf32>
    %36 = arith.mulf %34, %35 : vector<32x32xf32>
    %cst_16 = arith.constant dense<0.000000e+00> : vector<32xf32>
    %37 = vector.multi_reduction <add>, %36, %cst_16 [1] : vector<32x32xf32> to vector<32xf32>
    %38 = vector.shape_cast %37 : vector<32xf32> to vector<32x1xf32>
    %39 = arith.maximumf %11, %20 : vector<32x1xf32>
    %40 = arith.maximumf %39, %29 : vector<32x1xf32>
    %41 = arith.maximumf %40, %38 : vector<32x1xf32>
    %42 = arith.subf %11, %41 : vector<32x1xf32>
    %43 = math.exp %42 : vector<32x1xf32>
    %44 = arith.subf %20, %41 : vector<32x1xf32>
    %45 = math.exp %44 : vector<32x1xf32>
    %46 = arith.subf %29, %41 : vector<32x1xf32>
    %47 = math.exp %46 : vector<32x1xf32>
    %48 = arith.subf %38, %41 : vector<32x1xf32>
    %49 = math.exp %48 : vector<32x1xf32>
    %50 = arith.addf %43, %45 : vector<32x1xf32>
    %51 = arith.addf %50, %47 : vector<32x1xf32>
    %52 = arith.addf %51, %49 : vector<32x1xf32>
    %cst_17 = arith.constant 1.000000e+00 : f32
    %53 = vector.broadcast %cst_17 : f32 to vector<32x1xf32>
    %54 = arith.divf %53, %52 : vector<32x1xf32>
    %c0_18 = arith.constant 0 : index
    %c0_19 = arith.constant 0 : index
    %55 = vector.load %arg1[%c0_18, %c0_19] : memref<32x512xf32, #tpu.memory_space<vmem>>, vector<32x32xf32>
    %56 = arith.mulf %43, %54 : vector<32x1xf32>
    %57 = vector.broadcast %56 : vector<32x1xf32> to vector<32x32xf32>
    %58 = arith.mulf %57, %55 : vector<32x32xf32>
    %c0_20 = arith.constant 0 : index
    %c32_21 = arith.constant 32 : index
    %59 = vector.load %arg1[%c0_20, %c32_21] : memref<32x512xf32, #tpu.memory_space<vmem>>, vector<32x32xf32>
    %60 = arith.mulf %45, %54 : vector<32x1xf32>
    %61 = vector.broadcast %60 : vector<32x1xf32> to vector<32x32xf32>
    %62 = arith.mulf %61, %59 : vector<32x32xf32>
    %63 = arith.addf %58, %62 : vector<32x32xf32>
    %c0_22 = arith.constant 0 : index
    %c64_23 = arith.constant 64 : index
    %64 = vector.load %arg1[%c0_22, %c64_23] : memref<32x512xf32, #tpu.memory_space<vmem>>, vector<32x32xf32>
    %65 = arith.mulf %47, %54 : vector<32x1xf32>
    %66 = vector.broadcast %65 : vector<32x1xf32> to vector<32x32xf32>
    %67 = arith.mulf %66, %64 : vector<32x32xf32>
    %68 = arith.addf %63, %67 : vector<32x32xf32>
    %c0_24 = arith.constant 0 : index
    %c96_25 = arith.constant 96 : index
    %69 = vector.load %arg1[%c0_24, %c96_25] : memref<32x512xf32, #tpu.memory_space<vmem>>, vector<32x32xf32>
    %70 = arith.mulf %49, %54 : vector<32x1xf32>
    %71 = vector.broadcast %70 : vector<32x1xf32> to vector<32x32xf32>
    %72 = arith.mulf %71, %69 : vector<32x32xf32>
    %73 = arith.addf %68, %72 : vector<32x32xf32>
    %c0_26 = arith.constant 0 : index
    %c0_27 = arith.constant 0 : index
    %74 = vector.load %arg5[%c0_26, %c0_27] : memref<32x128xf32, #tpu.memory_space<vmem>>, vector<32x32xf32>
    tpu.vector_store %arg5[%c0_26, %c0_27], %73 {strides = array<i32>} : memref<32x128xf32, #tpu.memory_space<vmem>>, vector<32x32xf32>,
    %c0_28 = arith.constant 0 : index
    %c128 = arith.constant 128 : index
    %75 = vector.load %arg1[%c0_28, %c128] : memref<32x512xf32, #tpu.memory_space<vmem>>, vector<32x32xf32>
    %cst_29 = arith.constant dense<0.000000e+00> : vector<32x32xf32>
    %76 = tpu.matmul %75, %0, %cst_29 {dimension_numbers = #tpu.dot_dimension_numbers<[1], [0], [0], [1], [0, 0, 1, 1], [], []>} : vector<32x32xf32>, vector<32x32xf32>, vector<32x32xf32> -> vector<32x32xf32>
    %77 = vector.broadcast %1 : vector<1x32xf32> to vector<32x32xf32>
    %78 = arith.addf %76, %77 : vector<32x32xf32>
    %79 = math.tanh %78 : vector<32x32xf32>
    %80 = vector.broadcast %2 : vector<1x32xf32> to vector<32x32xf32>
    %81 = arith.mulf %79, %80 : vector<32x32xf32>
    %cst_30 = arith.constant dense<0.000000e+00> : vector<32xf32>
    %82 = vector.multi_reduction <add>, %81, %cst_30 [1] : vector<32x32xf32> to vector<32xf32>
    %83 = vector.shape_cast %82 : vector<32xf32> to vector<32x1xf32>
    %c0_31 = arith.constant 0 : index
    %c160 = arith.constant 160 : index
    %84 = vector.load %arg1[%c0_31, %c160] : memref<32x512xf32, #tpu.memory_space<vmem>>, vector<32x32xf32>
    %cst_32 = arith.constant dense<0.000000e+00> : vector<32x32xf32>
    %85 = tpu.matmul %84, %0, %cst_32 {dimension_numbers = #tpu.dot_dimension_numbers<[1], [0], [0], [1], [0, 0, 1, 1], [], []>} : vector<32x32xf32>, vector<32x32xf32>, vector<32x32xf32> -> vector<32x32xf32>
    %86 = vector.broadcast %1 : vector<1x32xf32> to vector<32x32xf32>
    %87 = arith.addf %85, %86 : vector<32x32xf32>
    %88 = math.tanh %87 : vector<32x32xf32>
    %89 = vector.broadcast %2 : vector<1x32xf32> to vector<32x32xf32>
    %90 = arith.mulf %88, %89 : vector<32x32xf32>
    %cst_33 = arith.constant dense<0.000000e+00> : vector<32xf32>
    %91 = vector.multi_reduction <add>, %90, %cst_33 [1] : vector<32x32xf32> to vector<32xf32>
    %92 = vector.shape_cast %91 : vector<32xf32> to vector<32x1xf32>
    %c0_34 = arith.constant 0 : index
    %c192 = arith.constant 192 : index
    %93 = vector.load %arg1[%c0_34, %c192] : memref<32x512xf32, #tpu.memory_space<vmem>>, vector<32x32xf32>
    %cst_35 = arith.constant dense<0.000000e+00> : vector<32x32xf32>
    %94 = tpu.matmul %93, %0, %cst_35 {dimension_numbers = #tpu.dot_dimension_numbers<[1], [0], [0], [1], [0, 0, 1, 1], [], []>} : vector<32x32xf32>, vector<32x32xf32>, vector<32x32xf32> -> vector<32x32xf32>
    %95 = vector.broadcast %1 : vector<1x32xf32> to vector<32x32xf32>
    %96 = arith.addf %94, %95 : vector<32x32xf32>
    %97 = math.tanh %96 : vector<32x32xf32>
    %98 = vector.broadcast %2 : vector<1x32xf32> to vector<32x32xf32>
    %99 = arith.mulf %97, %98 : vector<32x32xf32>
    %cst_36 = arith.constant dense<0.000000e+00> : vector<32xf32>
    %100 = vector.multi_reduction <add>, %99, %cst_36 [1] : vector<32x32xf32> to vector<32xf32>
    %101 = vector.shape_cast %100 : vector<32xf32> to vector<32x1xf32>
    %c0_37 = arith.constant 0 : index
    %c224 = arith.constant 224 : index
    %102 = vector.load %arg1[%c0_37, %c224] : memref<32x512xf32, #tpu.memory_space<vmem>>, vector<32x32xf32>
    %cst_38 = arith.constant dense<0.000000e+00> : vector<32x32xf32>
    %103 = tpu.matmul %102, %0, %cst_38 {dimension_numbers = #tpu.dot_dimension_numbers<[1], [0], [0], [1], [0, 0, 1, 1], [], []>} : vector<32x32xf32>, vector<32x32xf32>, vector<32x32xf32> -> vector<32x32xf32>
    %104 = vector.broadcast %1 : vector<1x32xf32> to vector<32x32xf32>
    %105 = arith.addf %103, %104 : vector<32x32xf32>
    %106 = math.tanh %105 : vector<32x32xf32>
    %107 = vector.broadcast %2 : vector<1x32xf32> to vector<32x32xf32>
    %108 = arith.mulf %106, %107 : vector<32x32xf32>
    %cst_39 = arith.constant dense<0.000000e+00> : vector<32xf32>
    %109 = vector.multi_reduction <add>, %108, %cst_39 [1] : vector<32x32xf32> to vector<32xf32>
    %110 = vector.shape_cast %109 : vector<32xf32> to vector<32x1xf32>
    %111 = arith.maximumf %83, %92 : vector<32x1xf32>
    %112 = arith.maximumf %111, %101 : vector<32x1xf32>
    %113 = arith.maximumf %112, %110 : vector<32x1xf32>
    %114 = arith.subf %83, %113 : vector<32x1xf32>
    %115 = math.exp %114 : vector<32x1xf32>
    %116 = arith.subf %92, %113 : vector<32x1xf32>
    %117 = math.exp %116 : vector<32x1xf32>
    %118 = arith.subf %101, %113 : vector<32x1xf32>
    %119 = math.exp %118 : vector<32x1xf32>
    %120 = arith.subf %110, %113 : vector<32x1xf32>
    %121 = math.exp %120 : vector<32x1xf32>
    %122 = arith.addf %115, %117 : vector<32x1xf32>
    %123 = arith.addf %122, %119 : vector<32x1xf32>
    %124 = arith.addf %123, %121 : vector<32x1xf32>
    %cst_40 = arith.constant 1.000000e+00 : f32
    %125 = vector.broadcast %cst_40 : f32 to vector<32x1xf32>
    %126 = arith.divf %125, %124 : vector<32x1xf32>
    %c0_41 = arith.constant 0 : index
    %c128_42 = arith.constant 128 : index
    %127 = vector.load %arg1[%c0_41, %c128_42] : memref<32x512xf32, #tpu.memory_space<vmem>>, vector<32x32xf32>
    %128 = arith.mulf %115, %126 : vector<32x1xf32>
    %129 = vector.broadcast %128 : vector<32x1xf32> to vector<32x32xf32>
    %130 = arith.mulf %129, %127 : vector<32x32xf32>
    %c0_43 = arith.constant 0 : index
    %c160_44 = arith.constant 160 : index
    %131 = vector.load %arg1[%c0_43, %c160_44] : memref<32x512xf32, #tpu.memory_space<vmem>>, vector<32x32xf32>
    %132 = arith.mulf %117, %126 : vector<32x1xf32>
    %133 = vector.broadcast %132 : vector<32x1xf32> to vector<32x32xf32>
    %134 = arith.mulf %133, %131 : vector<32x32xf32>
    %135 = arith.addf %130, %134 : vector<32x32xf32>
    %c0_45 = arith.constant 0 : index
    %c192_46 = arith.constant 192 : index
    %136 = vector.load %arg1[%c0_45, %c192_46] : memref<32x512xf32, #tpu.memory_space<vmem>>, vector<32x32xf32>
    %137 = arith.mulf %119, %126 : vector<32x1xf32>
    %138 = vector.broadcast %137 : vector<32x1xf32> to vector<32x32xf32>
    %139 = arith.mulf %138, %136 : vector<32x32xf32>
    %140 = arith.addf %135, %139 : vector<32x32xf32>
    %c0_47 = arith.constant 0 : index
    %c224_48 = arith.constant 224 : index
    %141 = vector.load %arg1[%c0_47, %c224_48] : memref<32x512xf32, #tpu.memory_space<vmem>>, vector<32x32xf32>
    %142 = arith.mulf %121, %126 : vector<32x1xf32>
    %143 = vector.broadcast %142 : vector<32x1xf32> to vector<32x32xf32>
    %144 = arith.mulf %143, %141 : vector<32x32xf32>
    %145 = arith.addf %140, %144 : vector<32x32xf32>
    %c0_49 = arith.constant 0 : index
    %c32_50 = arith.constant 32 : index
    %146 = vector.load %arg5[%c0_49, %c32_50] : memref<32x128xf32, #tpu.memory_space<vmem>>, vector<32x32xf32>
    tpu.vector_store %arg5[%c0_49, %c32_50], %145 {strides = array<i32>} : memref<32x128xf32, #tpu.memory_space<vmem>>, vector<32x32xf32>,
    %c0_51 = arith.constant 0 : index
    %c256 = arith.constant 256 : index
    %147 = vector.load %arg1[%c0_51, %c256] : memref<32x512xf32, #tpu.memory_space<vmem>>, vector<32x32xf32>
    %cst_52 = arith.constant dense<0.000000e+00> : vector<32x32xf32>
    %148 = tpu.matmul %147, %0, %cst_52 {dimension_numbers = #tpu.dot_dimension_numbers<[1], [0], [0], [1], [0, 0, 1, 1], [], []>} : vector<32x32xf32>, vector<32x32xf32>, vector<32x32xf32> -> vector<32x32xf32>
    %149 = vector.broadcast %1 : vector<1x32xf32> to vector<32x32xf32>
    %150 = arith.addf %148, %149 : vector<32x32xf32>
    %151 = math.tanh %150 : vector<32x32xf32>
    %152 = vector.broadcast %2 : vector<1x32xf32> to vector<32x32xf32>
    %153 = arith.mulf %151, %152 : vector<32x32xf32>
    %cst_53 = arith.constant dense<0.000000e+00> : vector<32xf32>
    %154 = vector.multi_reduction <add>, %153, %cst_53 [1] : vector<32x32xf32> to vector<32xf32>
    %155 = vector.shape_cast %154 : vector<32xf32> to vector<32x1xf32>
    %c0_54 = arith.constant 0 : index
    %c288 = arith.constant 288 : index
    %156 = vector.load %arg1[%c0_54, %c288] : memref<32x512xf32, #tpu.memory_space<vmem>>, vector<32x32xf32>
    %cst_55 = arith.constant dense<0.000000e+00> : vector<32x32xf32>
    %157 = tpu.matmul %156, %0, %cst_55 {dimension_numbers = #tpu.dot_dimension_numbers<[1], [0], [0], [1], [0, 0, 1, 1], [], []>} : vector<32x32xf32>, vector<32x32xf32>, vector<32x32xf32> -> vector<32x32xf32>
    %158 = vector.broadcast %1 : vector<1x32xf32> to vector<32x32xf32>
    %159 = arith.addf %157, %158 : vector<32x32xf32>
    %160 = math.tanh %159 : vector<32x32xf32>
    %161 = vector.broadcast %2 : vector<1x32xf32> to vector<32x32xf32>
    %162 = arith.mulf %160, %161 : vector<32x32xf32>
    %cst_56 = arith.constant dense<0.000000e+00> : vector<32xf32>
    %163 = vector.multi_reduction <add>, %162, %cst_56 [1] : vector<32x32xf32> to vector<32xf32>
    %164 = vector.shape_cast %163 : vector<32xf32> to vector<32x1xf32>
    %c0_57 = arith.constant 0 : index
    %c320 = arith.constant 320 : index
    %165 = vector.load %arg1[%c0_57, %c320] : memref<32x512xf32, #tpu.memory_space<vmem>>, vector<32x32xf32>
    %cst_58 = arith.constant dense<0.000000e+00> : vector<32x32xf32>
    %166 = tpu.matmul %165, %0, %cst_58 {dimension_numbers = #tpu.dot_dimension_numbers<[1], [0], [0], [1], [0, 0, 1, 1], [], []>} : vector<32x32xf32>, vector<32x32xf32>, vector<32x32xf32> -> vector<32x32xf32>
    %167 = vector.broadcast %1 : vector<1x32xf32> to vector<32x32xf32>
    %168 = arith.addf %166, %167 : vector<32x32xf32>
    %169 = math.tanh %168 : vector<32x32xf32>
    %170 = vector.broadcast %2 : vector<1x32xf32> to vector<32x32xf32>
    %171 = arith.mulf %169, %170 : vector<32x32xf32>
    %cst_59 = arith.constant dense<0.000000e+00> : vector<32xf32>
    %172 = vector.multi_reduction <add>, %171, %cst_59 [1] : vector<32x32xf32> to vector<32xf32>
    %173 = vector.shape_cast %172 : vector<32xf32> to vector<32x1xf32>
    %c0_60 = arith.constant 0 : index
    %c352 = arith.constant 352 : index
    %174 = vector.load %arg1[%c0_60, %c352] : memref<32x512xf32, #tpu.memory_space<vmem>>, vector<32x32xf32>
    %cst_61 = arith.constant dense<0.000000e+00> : vector<32x32xf32>
    %175 = tpu.matmul %174, %0, %cst_61 {dimension_numbers = #tpu.dot_dimension_numbers<[1], [0], [0], [1], [0, 0, 1, 1], [], []>} : vector<32x32xf32>, vector<32x32xf32>, vector<32x32xf32> -> vector<32x32xf32>
    %176 = vector.broadcast %1 : vector<1x32xf32> to vector<32x32xf32>
    %177 = arith.addf %175, %176 : vector<32x32xf32>
    %178 = math.tanh %177 : vector<32x32xf32>
    %179 = vector.broadcast %2 : vector<1x32xf32> to vector<32x32xf32>
    %180 = arith.mulf %178, %179 : vector<32x32xf32>
    %cst_62 = arith.constant dense<0.000000e+00> : vector<32xf32>
    %181 = vector.multi_reduction <add>, %180, %cst_62 [1] : vector<32x32xf32> to vector<32xf32>
    %182 = vector.shape_cast %181 : vector<32xf32> to vector<32x1xf32>
    %183 = arith.maximumf %155, %164 : vector<32x1xf32>
    %184 = arith.maximumf %183, %173 : vector<32x1xf32>
    %185 = arith.maximumf %184, %182 : vector<32x1xf32>
    %186 = arith.subf %155, %185 : vector<32x1xf32>
    %187 = math.exp %186 : vector<32x1xf32>
    %188 = arith.subf %164, %185 : vector<32x1xf32>
    %189 = math.exp %188 : vector<32x1xf32>
    %190 = arith.subf %173, %185 : vector<32x1xf32>
    %191 = math.exp %190 : vector<32x1xf32>
    %192 = arith.subf %182, %185 : vector<32x1xf32>
    %193 = math.exp %192 : vector<32x1xf32>
    %194 = arith.addf %187, %189 : vector<32x1xf32>
    %195 = arith.addf %194, %191 : vector<32x1xf32>
    %196 = arith.addf %195, %193 : vector<32x1xf32>
    %cst_63 = arith.constant 1.000000e+00 : f32
    %197 = vector.broadcast %cst_63 : f32 to vector<32x1xf32>
    %198 = arith.divf %197, %196 : vector<32x1xf32>
    %c0_64 = arith.constant 0 : index
    %c256_65 = arith.constant 256 : index
    %199 = vector.load %arg1[%c0_64, %c256_65] : memref<32x512xf32, #tpu.memory_space<vmem>>, vector<32x32xf32>
    %200 = arith.mulf %187, %198 : vector<32x1xf32>
    %201 = vector.broadcast %200 : vector<32x1xf32> to vector<32x32xf32>
    %202 = arith.mulf %201, %199 : vector<32x32xf32>
    %c0_66 = arith.constant 0 : index
    %c288_67 = arith.constant 288 : index
    %203 = vector.load %arg1[%c0_66, %c288_67] : memref<32x512xf32, #tpu.memory_space<vmem>>, vector<32x32xf32>
    %204 = arith.mulf %189, %198 : vector<32x1xf32>
    %205 = vector.broadcast %204 : vector<32x1xf32> to vector<32x32xf32>
    %206 = arith.mulf %205, %203 : vector<32x32xf32>
    %207 = arith.addf %202, %206 : vector<32x32xf32>
    %c0_68 = arith.constant 0 : index
    %c320_69 = arith.constant 320 : index
    %208 = vector.load %arg1[%c0_68, %c320_69] : memref<32x512xf32, #tpu.memory_space<vmem>>, vector<32x32xf32>
    %209 = arith.mulf %191, %198 : vector<32x1xf32>
    %210 = vector.broadcast %209 : vector<32x1xf32> to vector<32x32xf32>
    %211 = arith.mulf %210, %208 : vector<32x32xf32>
    %212 = arith.addf %207, %211 : vector<32x32xf32>
    %c0_70 = arith.constant 0 : index
    %c352_71 = arith.constant 352 : index
    %213 = vector.load %arg1[%c0_70, %c352_71] : memref<32x512xf32, #tpu.memory_space<vmem>>, vector<32x32xf32>
    %214 = arith.mulf %193, %198 : vector<32x1xf32>
    %215 = vector.broadcast %214 : vector<32x1xf32> to vector<32x32xf32>
    %216 = arith.mulf %215, %213 : vector<32x32xf32>
    %217 = arith.addf %212, %216 : vector<32x32xf32>
    %c0_72 = arith.constant 0 : index
    %c64_73 = arith.constant 64 : index
    %218 = vector.load %arg5[%c0_72, %c64_73] : memref<32x128xf32, #tpu.memory_space<vmem>>, vector<32x32xf32>
    tpu.vector_store %arg5[%c0_72, %c64_73], %217 {strides = array<i32>} : memref<32x128xf32, #tpu.memory_space<vmem>>, vector<32x32xf32>,
    %c0_74 = arith.constant 0 : index
    %c384 = arith.constant 384 : index
    %219 = vector.load %arg1[%c0_74, %c384] : memref<32x512xf32, #tpu.memory_space<vmem>>, vector<32x32xf32>
    %cst_75 = arith.constant dense<0.000000e+00> : vector<32x32xf32>
    %220 = tpu.matmul %219, %0, %cst_75 {dimension_numbers = #tpu.dot_dimension_numbers<[1], [0], [0], [1], [0, 0, 1, 1], [], []>} : vector<32x32xf32>, vector<32x32xf32>, vector<32x32xf32> -> vector<32x32xf32>
    %221 = vector.broadcast %1 : vector<1x32xf32> to vector<32x32xf32>
    %222 = arith.addf %220, %221 : vector<32x32xf32>
    %223 = math.tanh %222 : vector<32x32xf32>
    %224 = vector.broadcast %2 : vector<1x32xf32> to vector<32x32xf32>
    %225 = arith.mulf %223, %224 : vector<32x32xf32>
    %cst_76 = arith.constant dense<0.000000e+00> : vector<32xf32>
    %226 = vector.multi_reduction <add>, %225, %cst_76 [1] : vector<32x32xf32> to vector<32xf32>
    %227 = vector.shape_cast %226 : vector<32xf32> to vector<32x1xf32>
    %c0_77 = arith.constant 0 : index
    %c416 = arith.constant 416 : index
    %228 = vector.load %arg1[%c0_77, %c416] : memref<32x512xf32, #tpu.memory_space<vmem>>, vector<32x32xf32>
    %cst_78 = arith.constant dense<0.000000e+00> : vector<32x32xf32>
    %229 = tpu.matmul %228, %0, %cst_78 {dimension_numbers = #tpu.dot_dimension_numbers<[1], [0], [0], [1], [0, 0, 1, 1], [], []>} : vector<32x32xf32>, vector<32x32xf32>, vector<32x32xf32> -> vector<32x32xf32>
    %230 = vector.broadcast %1 : vector<1x32xf32> to vector<32x32xf32>
    %231 = arith.addf %229, %230 : vector<32x32xf32>
    %232 = math.tanh %231 : vector<32x32xf32>
    %233 = vector.broadcast %2 : vector<1x32xf32> to vector<32x32xf32>
    %234 = arith.mulf %232, %233 : vector<32x32xf32>
    %cst_79 = arith.constant dense<0.000000e+00> : vector<32xf32>
    %235 = vector.multi_reduction <add>, %234, %cst_79 [1] : vector<32x32xf32> to vector<32xf32>
    %236 = vector.shape_cast %235 : vector<32xf32> to vector<32x1xf32>
    %c0_80 = arith.constant 0 : index
    %c448 = arith.constant 448 : index
    %237 = vector.load %arg1[%c0_80, %c448] : memref<32x512xf32, #tpu.memory_space<vmem>>, vector<32x32xf32>
    %cst_81 = arith.constant dense<0.000000e+00> : vector<32x32xf32>
    %238 = tpu.matmul %237, %0, %cst_81 {dimension_numbers = #tpu.dot_dimension_numbers<[1], [0], [0], [1], [0, 0, 1, 1], [], []>} : vector<32x32xf32>, vector<32x32xf32>, vector<32x32xf32> -> vector<32x32xf32>
    %239 = vector.broadcast %1 : vector<1x32xf32> to vector<32x32xf32>
    %240 = arith.addf %238, %239 : vector<32x32xf32>
    %241 = math.tanh %240 : vector<32x32xf32>
    %242 = vector.broadcast %2 : vector<1x32xf32> to vector<32x32xf32>
    %243 = arith.mulf %241, %242 : vector<32x32xf32>
    %cst_82 = arith.constant dense<0.000000e+00> : vector<32xf32>
    %244 = vector.multi_reduction <add>, %243, %cst_82 [1] : vector<32x32xf32> to vector<32xf32>
    %245 = vector.shape_cast %244 : vector<32xf32> to vector<32x1xf32>
    %c0_83 = arith.constant 0 : index
    %c480 = arith.constant 480 : index
    %246 = vector.load %arg1[%c0_83, %c480] : memref<32x512xf32, #tpu.memory_space<vmem>>, vector<32x32xf32>
    %cst_84 = arith.constant dense<0.000000e+00> : vector<32x32xf32>
    %247 = tpu.matmul %246, %0, %cst_84 {dimension_numbers = #tpu.dot_dimension_numbers<[1], [0], [0], [1], [0, 0, 1, 1], [], []>} : vector<32x32xf32>, vector<32x32xf32>, vector<32x32xf32> -> vector<32x32xf32>
    %248 = vector.broadcast %1 : vector<1x32xf32> to vector<32x32xf32>
    %249 = arith.addf %247, %248 : vector<32x32xf32>
    %250 = math.tanh %249 : vector<32x32xf32>
    %251 = vector.broadcast %2 : vector<1x32xf32> to vector<32x32xf32>
    %252 = arith.mulf %250, %251 : vector<32x32xf32>
    %cst_85 = arith.constant dense<0.000000e+00> : vector<32xf32>
    %253 = vector.multi_reduction <add>, %252, %cst_85 [1] : vector<32x32xf32> to vector<32xf32>
    %254 = vector.shape_cast %253 : vector<32xf32> to vector<32x1xf32>
    %255 = arith.maximumf %227, %236 : vector<32x1xf32>
    %256 = arith.maximumf %255, %245 : vector<32x1xf32>
    %257 = arith.maximumf %256, %254 : vector<32x1xf32>
    %258 = arith.subf %227, %257 : vector<32x1xf32>
    %259 = math.exp %258 : vector<32x1xf32>
    %260 = arith.subf %236, %257 : vector<32x1xf32>
    %261 = math.exp %260 : vector<32x1xf32>
    %262 = arith.subf %245, %257 : vector<32x1xf32>
    %263 = math.exp %262 : vector<32x1xf32>
    %264 = arith.subf %254, %257 : vector<32x1xf32>
    %265 = math.exp %264 : vector<32x1xf32>
    %266 = arith.addf %259, %261 : vector<32x1xf32>
    %267 = arith.addf %266, %263 : vector<32x1xf32>
    %268 = arith.addf %267, %265 : vector<32x1xf32>
    %cst_86 = arith.constant 1.000000e+00 : f32
    %269 = vector.broadcast %cst_86 : f32 to vector<32x1xf32>
    %270 = arith.divf %269, %268 : vector<32x1xf32>
    %c0_87 = arith.constant 0 : index
    %c384_88 = arith.constant 384 : index
    %271 = vector.load %arg1[%c0_87, %c384_88] : memref<32x512xf32, #tpu.memory_space<vmem>>, vector<32x32xf32>
    %272 = arith.mulf %259, %270 : vector<32x1xf32>
    %273 = vector.broadcast %272 : vector<32x1xf32> to vector<32x32xf32>
    %274 = arith.mulf %273, %271 : vector<32x32xf32>
    %c0_89 = arith.constant 0 : index
    %c416_90 = arith.constant 416 : index
    %275 = vector.load %arg1[%c0_89, %c416_90] : memref<32x512xf32, #tpu.memory_space<vmem>>, vector<32x32xf32>
    %276 = arith.mulf %261, %270 : vector<32x1xf32>
    %277 = vector.broadcast %276 : vector<32x1xf32> to vector<32x32xf32>
    %278 = arith.mulf %277, %275 : vector<32x32xf32>
    %279 = arith.addf %274, %278 : vector<32x32xf32>
    %c0_91 = arith.constant 0 : index
    %c448_92 = arith.constant 448 : index
    %280 = vector.load %arg1[%c0_91, %c448_92] : memref<32x512xf32, #tpu.memory_space<vmem>>, vector<32x32xf32>
    %281 = arith.mulf %263, %270 : vector<32x1xf32>
    %282 = vector.broadcast %281 : vector<32x1xf32> to vector<32x32xf32>
    %283 = arith.mulf %282, %280 : vector<32x32xf32>
    %284 = arith.addf %279, %283 : vector<32x32xf32>
    %c0_93 = arith.constant 0 : index
    %c480_94 = arith.constant 480 : index
    %285 = vector.load %arg1[%c0_93, %c480_94] : memref<32x512xf32, #tpu.memory_space<vmem>>, vector<32x32xf32>
    %286 = arith.mulf %265, %270 : vector<32x1xf32>
    %287 = vector.broadcast %286 : vector<32x1xf32> to vector<32x32xf32>
    %288 = arith.mulf %287, %285 : vector<32x32xf32>
    %289 = arith.addf %284, %288 : vector<32x32xf32>
    %c0_95 = arith.constant 0 : index
    %c96_96 = arith.constant 96 : index
    %290 = vector.load %arg5[%c0_95, %c96_96] : memref<32x128xf32, #tpu.memory_space<vmem>>, vector<32x32xf32>
    tpu.vector_store %arg5[%c0_95, %c96_96], %289 {strides = array<i32>} : memref<32x128xf32, #tpu.memory_space<vmem>>, vector<32x32xf32>,
    return
  }
  func.func @transform_0(%arg0: i32) -> (i32, i32) {
    %c0_i32 = arith.constant 0 : i32
    %c0_i32_0 = arith.constant 0 : i32
    return %arg0, %c0_i32 : i32, i32
  }
  func.func @transform_1(%arg0: i32) -> (i32, i32) {
    %c0_i32 = arith.constant 0 : i32
    %c0_i32_0 = arith.constant 0 : i32
    %c0_i32_1 = arith.constant 0 : i32
    return %c0_i32, %c0_i32_0 : i32, i32
  }
  func.func @transform_2(%arg0: i32) -> (i32, i32) {
    %c0_i32 = arith.constant 0 : i32
    %c0_i32_0 = arith.constant 0 : i32
    %c0_i32_1 = arith.constant 0 : i32
    return %c0_i32, %c0_i32_0 : i32, i32
  }
  func.func @transform_3(%arg0: i32) -> (i32, i32) {
    %c0_i32 = arith.constant 0 : i32
    %c0_i32_0 = arith.constant 0 : i32
    %c0_i32_1 = arith.constant 0 : i32
    return %c0_i32, %c0_i32_0 : i32, i32
  }
  func.func @transform_4(%arg0: i32) -> (i32, i32) {
    %c0_i32 = arith.constant 0 : i32
    %c0_i32_0 = arith.constant 0 : i32
    return %arg0, %c0_i32 : i32, i32
  }
}

</mosaic_0001>

<bundles_post_ra>
// kernel: tpu_custom_call.1
= control target key start
LH: loop header
LB: loop body
LE: loop exit
PB: predicated region body
PF: predicated region fallthrough
CT: control target
= control target key end

     0   :  { %9 = vsyncpa [#allocation3], 0  ;;  %s5418_s0 = inlined_call_operand.hbm [shape: f32[256,512], index: 0, kind: input, shape index: {}]   ;;  %s5419_s1 = inlined_call_operand.hbm [shape: f32[32,32], index: 1, kind: input, shape index: {}]   ;;  %s5420_s2 = inlined_call_operand.vmem [shape: f32[1,32], index: 2, kind: input, shape index: {}]   ;;  %s5421_s3 = inlined_call_operand.vmem [shape: f32[1,32], index: 3, kind: input, shape index: {}]   ;;  %s5422_s4 = inlined_call_operand.hbm [shape: f32[256,128], index: 4, kind: output, shape index: {}]  }
   0x1   :  { %11 = vsyncpa [#allocation3 + $0x1], 0 }
   0x2   :  { %12 = vsyncpa [#allocation6], 0 }
   0x3   :  { %13 = vsyncpa [#allocation4], 0 }
   0x4   :  { %15 = vsyncpa [#allocation4 + $0x1], 0  ;;  %s4010_s15 = smov 0   ;;  %s4012_s16 = smov 0  }
   0x5   :  { %s4014_s17 = smov 0   ;;  %s4016_s18 = smov 0  }
   0x6 LB: > { %s4031_s19 = sadd.s32 4294967295, %s3971_s18   ;;  %s3041_s20 = sadd.s32 4294967294, %s3971_s18   ;;  %s3971_s18 = sphi %s4016_s18, %s5443_s18   ;;  %s3967_s17 = sphi %s4014_s17, %s5442_s17   ;;  %s3963_s16 = sphi %s4012_s16, %s5441_s16   ;;  %s3959_s15 = sphi %s4010_s15, %s5440_s15  }
   0x7   : > { %p41_p0 = scmp.ne.s32.totalorder %s3963_s16, %s3959_s15  ;;  %p5423_p1 = scmp.eq.s32.totalorder %s4031_s19, 0 }
   0x8   : > { %p134_p3 = scmp.eq.s32.totalorder %s3041_s20, 7  ;;  %p3042_p5 = scmp.ge.s32.totalorder %s3971_s18, 1 }
   0x9   : > { %p4040_p4 = por %p5423_p1, %p41_p0  ;;  %p141_p7 = scmp.lt.s32.totalorder %s3971_s18, 9 }
   0xa   : > { %p4045_p6 = por %p134_p3, %p41_p0  ;;  %s3973_s24 = smov [#allocation5]  }
   0xb   : > { %s5427_s21 = scalar_select %p4040_p4, 1, 0 }
   0xc   : > { %s5428_s22 = scalar_select %p4045_p6, 1, 0 }
   0xd   : > { %p4050_p8 = pnand %p3042_p5, %p141_p7  ;;  %s153_s25 = sshll.u32 %s3973_s24, 4  ;;  %s154_s25 = int_to_ptr.vmem [resolvable:$true] %s153_s25 }
   0xe   : > { %s4063_s27 = sadd.s32 1, %s3971_s18   ;;  %s28_s28 = sadd.s32 1, %s3967_s17 }
   0xf   : > { %s5429_s23 = scalar_select %p4050_p8, 1, 0 }
  0x10   : > { %p3487_p9 = pneg %p4050_p8  ;;  %s25_s29 = ssub.s32 %s3971_s18, %s4063_s27 }
  0x11   : > { %s3860_s30 = scalar_lea.vmem %s154_s25, 512  ;;  %p3868_p3 = scmp.lt.s32.totalorder %s154_s25, %s154_s25 }
  0x12   : > { %p4058_p10 = pnand %p3487_p9, %p5423_p1  ;;  %p3861_p12 = scmp.ne.s32.totalorder %s154_s25, %s3860_s30 }
  0x13   : > { %p3869_p5 = scmp.lt.s32.totalorder %s3860_s30, %s3860_s30 }
  0x14   : > { %p3851_p11 = pneg %p4058_p10 }
  0x15   : > { %p3870_p7 = por %p3869_p5, %p3868_p3 }
  0x16   : > { %p3863_p13 = pnand %p3861_p12, %p3851_p11 }
  0x18   : > { %p3864_p0 = pneg %p3863_p13 }
  0x1a   : > { %p3871_p2 = pnand %p3870_p7, %p3864_p0 }
  0x1c   : > { %3874 = shalt.err (!%p3871_p2)
}
  0x1d   : > { %s3974_s5 = smov 128   ;;  %s3975_s6 = smov 8  }
  0x1e   : > { %3490 = dma.hbm_to_vmem [thread:$0]  (!%p4058_p10), %s5419_s1, 512, %s154_s25, [#allocation6], %s3974_s5, %s3974_s5, %s3975_s6  }
  0x1f   : > { %p26_p9 = scmp.eq.s32.totalorder %s25_s29, 0  ;;  %p35_p11 = scmp.ne.s32.totalorder %s3967_s17, %s3963_s16 }
  0x20   : > { %p36_p12 = scmp.eq.s32.totalorder %s3971_s18, 0  ;;  %p3500_p2 = scmp.lt.s32.totalorder %s3971_s18, 8 }
  0x21   : > { %s4080_s9 = scalar_select %p26_p9, %s3967_s17, %s28_s28  }
  0x22   : > { %p37_p13 = por %p36_p12, %p35_p11  ;;  %p5431_p0 = scmp.eq.s32.totalorder %s4031_s19, 7 }
  0x23   : > { %s173_s11 = sand.u32 1, %s3967_s17   ;;  %s3125_s12 = sshll.u32 %s3971_s18, 11 }
  0x24   : > { %p4084_p3 = por %p5431_p0, %p35_p11  ;;  %s3045_s13 = sshll.u32 %s173_s11, 7 }
  0x25   : > { %s4093_s24 = scalar_lea.hbm %s5418_s0, %s3125_s12  ;;  %s177_s25 = scalar_lea.vmem [#allocation2], %s3045_s13 }
  0x26   : > { %s5432_s10 = scalar_select %p4084_p3, 1, 0 }
  0x27   : > { %s185_s26 = sshll.u32 %s177_s25, 4  ;;  %p4095_p10 = pnand %p3500_p2, %p37_p13  ;;  %s4099_s26 = int_to_ptr.vmem [resolvable:$true] %s185_s26 }
  0x28   : > { %s4101_s29 = scalar_lea.sflag [#allocation3], %s173_s11  ;;  %s3875_s30 = scalar_lea.hbm %s4093_s24, 2048 }
  0x29   : > { %p3876_p5 = scmp.ne.s32.totalorder %s4093_s24, %s3875_s30  ;;  %p3877_p7 = pneg %p4095_p10 }
  0x2a   : > { %s3880_s7 = scalar_lea.hbm %s5418_s0, 16384  ;;  %p3881_p12 = scmp.lt.s32.totalorder %s4093_s24, %s5418_s0 }
  0x2b   : > { %p3878_p9 = pnand %p3877_p7, %p3876_p5  ;;  %p3882_p2 = scmp.lt.s32.totalorder %s3880_s7, %s3875_s30 }
  0x2d   : > { %p3879_p11 = pneg %p3878_p9  ;;  %p3883_p13 = por %p3882_p2, %p3881_p12 }
  0x2f   : > { %p3884_p0 = pnand %p3883_p13, %p3879_p11 }
  0x31   : > { %3887 = shalt.err (!%p3884_p0)
}
  0x32   : > { %s3888_s11 = scalar_lea.vmem %s4099_s26, 2048  ;;  %s3976_s13 = smov [#allocation2]  }
  0x33   : > { %p3889_p1 = scmp.ne.s32.totalorder %s4099_s26, %s3888_s11  ;;  %s3893_s14 = sshll.u32 %s3976_s13, 4  ;;  %s3894_s14 = int_to_ptr.vmem [resolvable:$false] %s3893_s14 }
  0x34   : > { %s3895_s20 = scalar_lea.vmem %s3894_s14, 4096  ;;  %p3896_p9 = scmp.lt.s32.totalorder %s4099_s26, %s3894_s14 }
  0x35   : > { %p3891_p6 = pnand %p3889_p1, %p3877_p7  ;;  %p3897_p3 = scmp.lt.s32.totalorder %s3895_s20, %s3888_s11 }
  0x37   : > { %p3892_p5 = pneg %p3891_p6  ;;  %p3898_p4 = por %p3897_p3, %p3896_p9 }
  0x39   : > { %p3899_p8 = pnand %p3898_p4, %p3892_p5 }
  0x3b   : > { %3902 = shalt.err (!%p3899_p8)
}
  0x3c   : > { %s3977_s25 = smov 512   ;;  %s3978_s30 = smov 32  }
  0x3d   : > { %3494 = dma.hbm_to_vmem [thread:$0]  (!%p4095_p10), %s4093_s24, 2048, %s4099_s26, %s4101_s29, %s3977_s25, %s3977_s25, %s3978_s30  }
  0x3e   : > { %p5434_p1 = scmp.ne.s32.totalorder %s5429_s23, 0 }
  0x3f   : > { %s4125_s5 = sand.u32 (!%p5434_p1), 1, %s3963_s16   ;;  %p5435_p4 = scmp.ne.s32.totalorder (!%p5434_p1), %s5427_s21, 0 }
  0x40   : > { %197 = sbr.rel (%p5434_p1) target bundleno = 1001 (0x3e9), region = 36  ;;  %s3050_s6 = sshll.u32 (!%p5434_p1), %s4125_s5, 7 }
  0x41   : > { %s200_s7 = scalar_lea.sflag (!%p5434_p1), [#allocation3], %s4125_s5  ;;  %s4129_s8 = scalar_lea.vmem (!%p5434_p1), [#allocation2], %s3050_s6 }
  0x45   : > { %3946 = dma.done.wait (%p5435_p4), %s200_s7, 2048  }
  0x46   : > { %3948 = vsyncadd (%p5435_p4), %s200_s7, 4294965248  ;;  %p5436_p6 = scmp.eq.s32.totalorder %s4031_s19, 0 }
  0x48   : > { %3950 = dma.done.wait (%p5436_p6), [#allocation6], 512   ;;  %p5437_p8 = pmov %p5436_p6 }
  0x49   : > { %vm250_vm0 = vcmask 261120   ;;  %v241_v0 = vld [vmem:[%s4129_s8 + $0x20] sm:$0xff]  ;;  %s3979_s23 = smov 96   ;;  %v4143_v2 = vld [vmem:[#allocation5 + $0x18] sm:$0xff]  ;;  %s3980_s21 = smov 64   ;;  %v4153_v4 = vld [vmem:[#allocation5 + $0x10] sm:$0xff] }
  0x4a   : > { %3952 = vsyncadd (%p5437_p8), [#allocation6], 4294966784  ;;  %v240_v1 = vld [vmem:[%s4129_s8] sm:$0xff]  ;;  %376 = vrot.lane.b32.xlu1 %v241_v0, %s3979_s23  ;;  %3255 = vmatprep.subr.mxu0 %v4143_v2  ;;  %v4157_v6 = vld [vmem:[#allocation5 + $0x8] sm:$0xff]  ;;  %s3981_s24 = smov 32   ;;  %s3052_s11 = sshll.u32 %s4125_s5, 5 }
  0x4b   : > { %374 = vrot.lane.b32.xlu0 %v240_v1, %s3979_s23  ;;  %v242_v3 = vld [vmem:[%s4129_s8 + $0x40] sm:$0xff]  ;;  %3263 = vmatprep.mubr.msk.f32.mxu0 %vm250_vm0, %v240_v1  ;;  %v4169_v8 = vld [vmem:[%s4129_s8 + $0x28] sm:$0xff]  ;;  %v4215_v11 = vld [vmem:[%s4129_s8 + $0x30] sm:$0xff]  ;;  %s5276_s13 = scalar_lea.vmem [#allocation7], %s3052_s11  ;;  %vm1585_vm1 = vcmask 523520   ;;  %vm2262_vm2 = vcmask 785920  }
  0x4c   : > { %3256 = vmatpush3.msra.mxu0 %v4143_v2  ;;  %3269 = vmatprep.subr.mxu1 %v4143_v2  ;;  %v243_v5 = vld [vmem:[%s4129_s8 + $0x60] sm:$0xff]  ;;  %v4181_v9 = vld [vmem:[%s4129_s8 + $0x68] sm:$0xff]  ;;  %v4225_v13 = vld [vmem:[%s4129_s8 + $0x70] sm:$0xff]  ;;  %vm2939_vm3 = vcmask 1048320   ;;  %s3126_s14 = sshll.u32 %s4031_s19, 9  ;;  %s2958_s20 = sshll.u32 %s5276_s13, 4  ;;  %s5375_s20 = int_to_ptr.vmem [resolvable:$true] %s2958_s20 }
  0x4d   : > { %3270 = vmatpush3.msra.mxu1 %v4143_v2  ;;  %3257 = vmatprep.subr.mxu0 %v4153_v4  ;;  %v4163_v7 = vld [vmem:[#allocation5] sm:$0xff]  ;;  %v4212_v10 = vld [vmem:[%s4129_s8 + $0x8] sm:$0xff]  ;;  %v4248_v14 = vld [vmem:[%s4129_s8 + $0x10] sm:$0xff]  ;;  %s5373_s6 = scalar_lea.hbm %s5422_s4, %s3126_s14  ;;  %s2945_s7 = scalar_lea.sflag [#allocation4], %s4125_s5 }
  0x4e   : > { %378 = vrot.lane.b32.xlu1 %v242_v3, %s3979_s23  ;;  %3271 = vmatprep.subr.mxu1 %v4153_v4  ;;  %v4222_v12 = vld [vmem:[%s4129_s8 + $0x48] sm:$0xff]  ;;  %v4251_v15 = vld [vmem:[%s4129_s8 + $0x38] sm:$0xff]  ;;  %v4258_v16 = vld [vmem:[%s4129_s8 + $0x50] sm:$0xff]  ;;  %p5438_p10 = scmp.ne.s32.totalorder %s5432_s10, 0  ;;  %s3982_s19 = smov [#allocation7]  }
  0x4f   : > { %495 = vrot.lane.b32.xlu0 %v240_v1, %s3980_s21  ;;  %3258 = vmatpush3.msra.mxu0 %v4153_v4  ;;  %v4261_v17 = vld [vmem:[%s4129_s8 + $0x78] sm:$0xff]  ;;  %v4464_v62 = vld [vmem:[%s5420_s2] ss:$0 sm:$0xff] }
  0x50   : > { %3272 = vmatpush3.msra.mxu1 %v4153_v4  ;;  %3259 = vmatprep.subr.mxu0 %v4157_v6  ;;  %v4284_v18 = vld [vmem:[%s4129_s8 + $0x18] sm:$0xff] }
  0x51   : > { %3273 = vmatprep.subr.mxu1 %v4157_v6  ;;  %3260 = vmatpush3.msra.mxu0 %v4157_v6  ;;  %v4289_v19 = vld [vmem:[%s4129_s8 + $0x58] sm:$0xff] }
  0x52   : > { %380 = vrot.lane.b32.xlu1 %v243_v5, %s3979_s23  ;;  %3274 = vmatpush3.msra.mxu1 %v4157_v6 }
  0x53   : > { %616 = vrot.lane.b32.xlu0 %v240_v1, %s3981_s24  ;;  %3261 = vmatprep.subr.mxu0 %v4163_v7 }
  0x54   : > { %3275 = vmatprep.subr.mxu1 %v4163_v7  ;;  %3262 = vmatpush3.msra.mxu0 %v4163_v7 }
  0x55   : > { %3276 = vmatpush3.msra.mxu1 %v4163_v7  ;;  %3264 = vmatmul.mubr.msk.f32.vlgmr.msra.gmra.mxu0 %vm250_vm0, %v241_v0 }
  0x56   : > { %497 = vrot.lane.b32.xlu1 %v241_v0, %s3980_s21  ;;  %3283 = vmatprep.subr.mxu0 %v4143_v2 }
  0x57   : > { %1036 = vrot.lane.b32.xlu0 %v4169_v8, %s3979_s23  ;;  %3266 = vmatprep.mubr.msk.f32.mxu0 %vm250_vm0, %v242_v3 }
  0x58   : > { %3284 = vmatpush3.msra.mxu0 %v4143_v2  ;;  %3297 = vmatprep.subr.mxu1 %v4143_v2 }
  0x59   : > { %3285 = vmatprep.subr.mxu0 %v4153_v4  ;;  %3267 = vmatmul.mubr.msk.f32.gmra.mxu0 %vm250_vm0, %v243_v5 }
  0x5a   : > { %499 = vrot.lane.b32.xlu1 %v242_v3, %s3980_s21  ;;  %3286 = vmatpush3.msra.mxu0 %v4153_v4 }
  0x5b   : > { %1040 = vrot.lane.b32.xlu0 %v4181_v9, %s3979_s23  ;;  %3287 = vmatprep.subr.mxu0 %v4157_v6 }
  0x5c   : > { %3288 = vmatpush3.msra.mxu0 %v4157_v6 }
  0x5d   : > { %3289 = vmatprep.subr.mxu0 %v4163_v7 }
  0x5e   : > { %501 = vrot.lane.b32.xlu1 %v243_v5, %s3980_s21  ;;  %3290 = vmatpush3.msra.mxu0 %v4163_v7 }
  0x5f   : > { %1157 = vrot.lane.b32.xlu0 %v4169_v8, %s3980_s21  ;;  %3311 = vmatprep.subr.mxu0 %v4143_v2 }
  0x62   : > { %618 = vrot.lane.b32.xlu1 %v241_v0, %s3981_s24 }
  0x63   : > { %1278 = vrot.lane.b32.xlu0 %v4169_v8, %s3981_s24 }
  0x66   : > { %620 = vrot.lane.b32.xlu1 %v242_v3, %s3981_s24 }
  0x67   : > { %1161 = vrot.lane.b32.xlu0 %v4181_v9, %s3980_s21 }
  0x6a   : > { %622 = vrot.lane.b32.xlu1 %v243_v5, %s3981_s24 }
  0x6b   : > { %1282 = vrot.lane.b32.xlu0 %v4181_v9, %s3981_s24 }
  0x6e   : > { %1034 = vrot.lane.b32.xlu1 %v4212_v10, %s3979_s23 }
  0x6f   : > { %1713 = vrot.lane.b32.xlu0 %v4215_v11, %s3979_s23 }
  0x72   : > { %1038 = vrot.lane.b32.xlu1 %v4222_v12, %s3979_s23 }
  0x73   : > { %1717 = vrot.lane.b32.xlu0 %v4225_v13, %s3979_s23 }
  0x76   : > { %1155 = vrot.lane.b32.xlu1 %v4212_v10, %s3980_s21 }
  0x77   : > { %1834 = vrot.lane.b32.xlu0 %v4215_v11, %s3980_s21 }
  0x7a   : > { %1276 = vrot.lane.b32.xlu1 %v4212_v10, %s3981_s24 }
  0x7b   : > { %1955 = vrot.lane.b32.xlu0 %v4215_v11, %s3981_s24 }
  0x7e   : > { %1159 = vrot.lane.b32.xlu1 %v4222_v12, %s3980_s21 }
  0x7f   : > { %1838 = vrot.lane.b32.xlu0 %v4225_v13, %s3980_s21 }
  0x82   : > { %1280 = vrot.lane.b32.xlu1 %v4222_v12, %s3981_s24 }
  0x83   : > { %1959 = vrot.lane.b32.xlu0 %v4225_v13, %s3981_s24 }
  0x86   : > { %1711 = vrot.lane.b32.xlu1 %v4248_v14, %s3979_s23 }
  0x87   : > { %2390 = vrot.lane.b32.xlu0 %v4251_v15, %s3979_s23 }
  0x8a   : > { %1715 = vrot.lane.b32.xlu1 %v4258_v16, %s3979_s23 }
  0x8b   : > { %2394 = vrot.lane.b32.xlu0 %v4261_v17, %s3979_s23 }
  0x8e   : > { %1832 = vrot.lane.b32.xlu1 %v4248_v14, %s3980_s21 }
  0x8f   : > { %2511 = vrot.lane.b32.xlu0 %v4251_v15, %s3980_s21 }
  0x92   : > { %1953 = vrot.lane.b32.xlu1 %v4248_v14, %s3981_s24 }
  0x93   : > { %2632 = vrot.lane.b32.xlu0 %v4251_v15, %s3981_s24 }
  0x96   : > { %1836 = vrot.lane.b32.xlu1 %v4258_v16, %s3980_s21 }
  0x97   : > { %2515 = vrot.lane.b32.xlu0 %v4261_v17, %s3980_s21 }
  0x9a   : > { %1957 = vrot.lane.b32.xlu1 %v4258_v16, %s3981_s24 }
  0x9b   : > { %2636 = vrot.lane.b32.xlu0 %v4261_v17, %s3981_s24 }
  0x9e   : > { %2388 = vrot.lane.b32.xlu1 %v4284_v18, %s3979_s23 }
  0xa2   : > { %2392 = vrot.lane.b32.xlu1 %v4289_v19, %s3979_s23 }
  0xa6   : > { %2509 = vrot.lane.b32.xlu1 %v4284_v18, %s3980_s21 }
  0xaa   : > { %2630 = vrot.lane.b32.xlu1 %v4284_v18, %s3981_s24 }
  0xae   : > { %2513 = vrot.lane.b32.xlu1 %v4289_v19, %s3980_s21 }
  0xb2   : > { %2634 = vrot.lane.b32.xlu1 %v4289_v19, %s3981_s24 }
  0xbc   : > { %v377_v20 = vpop.permute.xlu1 %376 }
  0xbd   : > { %v375_v21 = vpop.permute.xlu0 %374 }
  0xbe   : > { %3277 = vmatprep.mubr.msk.f32.mxu1 %vm250_vm0, %v375_v21 }
  0xbf   : > { %3278 = vmatmul.mubr.msk.f32.vlgmr.msra.gmra.mxu1 %vm250_vm0, %v377_v20 }
  0xc0   : > { %3298 = vmatpush3.msra.mxu1 %v4143_v2  ;;  %v379_v22 = vpop.permute.xlu1 %378 }
  0xc1   : > { %v496_v23 = vpop.permute.xlu0 %495  ;;  %3299 = vmatprep.subr.mxu1 %v4153_v4  ;;  %3280 = vmatprep.mubr.msk.f32.mxu1 %vm250_vm0, %v379_v22 }
  0xc2   : > { %3291 = vmatprep.mubr.msk.f32.mxu0 %vm250_vm0, %v496_v23  ;;  %3300 = vmatpush3.msra.mxu1 %v4153_v4 }
  0xc3   : > { %3301 = vmatprep.subr.mxu1 %v4157_v6 }
  0xc4   : > { %v381_v24 = vpop.permute.xlu1 %380  ;;  %3302 = vmatpush3.msra.mxu1 %v4157_v6 }
  0xc5   : > { %v617_v25 = vpop.permute.xlu0 %616  ;;  %3281 = vmatmul.mubr.msk.f32.gmra.mxu1 %vm250_vm0, %v381_v24  ;;  %3303 = vmatprep.subr.mxu1 %v4163_v7 }
  0xc6   : > { %3304 = vmatpush3.msra.mxu1 %v4163_v7  ;;  %3305 = vmatprep.mubr.msk.f32.mxu1 %vm250_vm0, %v617_v25 }
  0xc7   : > { %3325 = vmatprep.subr.mxu1 %v4143_v2 }
  0xc8   : > { %v498_v26 = vpop.permute.xlu1 %497 }
  0xc9   : > { %v1037_v27 = vpop.permute.xlu0 %1036  ;;  %3292 = vmatmul.mubr.msk.f32.vlgmr.msra.gmra.mxu0 %vm250_vm0, %v498_v26 }
  0xca   : > { %3312 = vmatpush3.msra.mxu0 %v4143_v2 }
  0xcb   : > { %3313 = vmatprep.subr.mxu0 %v4153_v4 }
  0xcc   : > { %v500_v28 = vpop.permute.xlu1 %499  ;;  %3314 = vmatpush3.msra.mxu0 %v4153_v4 }
  0xcd   : > { %v1041_v29 = vpop.permute.xlu0 %1040  ;;  %3294 = vmatprep.mubr.msk.f32.mxu0 %vm250_vm0, %v500_v28  ;;  %3315 = vmatprep.subr.mxu0 %v4157_v6 }
  0xce   : > { %3316 = vmatpush3.msra.mxu0 %v4157_v6 }
  0xcf   : > { %3317 = vmatprep.subr.mxu0 %v4163_v7 }
  0xd0   : > { %v502_v30 = vpop.permute.xlu1 %501  ;;  %3318 = vmatpush3.msra.mxu0 %v4163_v7 }
  0xd1   : > { %v1158_v31 = vpop.permute.xlu0 %1157  ;;  %3295 = vmatmul.mubr.msk.f32.gmra.mxu0 %vm250_vm0, %v502_v30  ;;  %3339 = vmatprep.subr.mxu0 %v4143_v2 }
  0xd2   : > { %3319 = vmatprep.mubr.msk.f32.mxu0 %vm250_vm0, %v4212_v10 }
  0xd4   : > { %v619_v32 = vpop.permute.xlu1 %618 }
  0xd5   : > { %3306 = vmatmul.mubr.msk.f32.vlgmr.msra.gmra.mxu1 %vm250_vm0, %v619_v32  ;;  %3320 = vmatmul.mubr.msk.f32.vlgmr.msra.gmra.mxu0 %vm250_vm0, %v4169_v8  ;;  %v1279_v33 = vpop.permute.xlu0 %1278 }
  0xd6   : > { %3326 = vmatpush3.msra.mxu1 %v4143_v2  ;;  %3340 = vmatpush3.msra.mxu0 %v4143_v2 }
  0xd7   : > { %3327 = vmatprep.subr.mxu1 %v4153_v4  ;;  %3341 = vmatprep.subr.mxu0 %v4153_v4 }
  0xd8   : > { %v621_v34 = vpop.permute.xlu1 %620  ;;  %3328 = vmatpush3.msra.mxu1 %v4153_v4  ;;  %3322 = vmatprep.mubr.msk.f32.mxu0 %vm250_vm0, %v4222_v12 }
  0xd9   : > { %3308 = vmatprep.mubr.msk.f32.mxu1 %vm250_vm0, %v621_v34  ;;  %3329 = vmatprep.subr.mxu1 %v4157_v6  ;;  %v1162_v35 = vpop.permute.xlu0 %1161 }
  0xda   : > { %3330 = vmatpush3.msra.mxu1 %v4157_v6  ;;  %3342 = vmatpush3.msra.mxu0 %v4153_v4 }
  0xdb   : > { %3331 = vmatprep.subr.mxu1 %v4163_v7  ;;  %3323 = vmatmul.mubr.msk.f32.gmra.mxu0 %vm250_vm0, %v4181_v9 }
  0xdc   : > { %v623_v36 = vpop.permute.xlu1 %622  ;;  %3332 = vmatpush3.msra.mxu1 %v4163_v7  ;;  %3343 = vmatprep.subr.mxu0 %v4157_v6 }
  0xdd   : > { %3309 = vmatmul.mubr.msk.f32.gmra.mxu1 %vm250_vm0, %v623_v36  ;;  %3344 = vmatpush3.msra.mxu0 %v4157_v6  ;;  %v1283_v37 = vpop.permute.xlu0 %1282 }
  0xde   : > { %3345 = vmatprep.subr.mxu0 %v4163_v7  ;;  %3353 = vmatprep.subr.mxu1 %v4143_v2 }
  0xdf   : > { %3346 = vmatpush3.msra.mxu0 %v4163_v7 }
  0xe0   : > { %v1035_v38 = vpop.permute.xlu1 %1034  ;;  %3367 = vmatprep.subr.mxu0 %v4143_v2 }
  0xe1   : > { %3333 = vmatprep.mubr.msk.f32.mxu1 %vm250_vm0, %v1035_v38  ;;  %v1714_v40 = vpop.permute.xlu0 %1713 }
  0xe2   : > { %3334 = vmatmul.mubr.msk.f32.vlgmr.msra.gmra.mxu1 %vm250_vm0, %v1037_v27 }
  0xe3   : > { %3354 = vmatpush3.msra.mxu1 %v4143_v2 }
  0xe4   : > { %v1039_v39 = vpop.permute.xlu1 %1038  ;;  %3355 = vmatprep.subr.mxu1 %v4153_v4 }
  0xe5   : > { %3336 = vmatprep.mubr.msk.f32.mxu1 %vm250_vm0, %v1039_v39  ;;  %3356 = vmatpush3.msra.mxu1 %v4153_v4  ;;  %v1718_v42 = vpop.permute.xlu0 %1717 }
  0xe6   : > { %3337 = vmatmul.mubr.msk.f32.gmra.mxu1 %vm250_vm0, %v1041_v29  ;;  %3357 = vmatprep.subr.mxu1 %v4157_v6 }
  0xe7   : > { %3358 = vmatpush3.msra.mxu1 %v4157_v6 }
  0xe8   : > { %v1156_v41 = vpop.permute.xlu1 %1155  ;;  %3359 = vmatprep.subr.mxu1 %v4163_v7 }
  0xe9   : > { %3347 = vmatprep.mubr.msk.f32.mxu0 %vm250_vm0, %v1156_v41  ;;  %3360 = vmatpush3.msra.mxu1 %v4163_v7  ;;  %v1835_v45 = vpop.permute.xlu0 %1834 }
  0xea   : > { %3348 = vmatmul.mubr.msk.f32.vlgmr.msra.gmra.mxu0 %vm250_vm0, %v1158_v31  ;;  %3381 = vmatprep.subr.mxu1 %v4143_v2 }
  0xeb   : > { %3368 = vmatpush3.msra.mxu0 %v4143_v2 }
  0xec   : > { %v1277_v43 = vpop.permute.xlu1 %1276  ;;  %3369 = vmatprep.subr.mxu0 %v4153_v4 }
  0xed   : > { %3361 = vmatprep.mubr.msk.f32.mxu1 %vm250_vm0, %v1277_v43  ;;  %3370 = vmatpush3.msra.mxu0 %v4153_v4  ;;  %v1956_v47 = vpop.permute.xlu0 %1955 }
  0xee   : > { %3362 = vmatmul.mubr.msk.f32.vlgmr.msra.gmra.mxu1 %vm250_vm0, %v1279_v33  ;;  %3371 = vmatprep.subr.mxu0 %v4157_v6 }
  0xef   : > { %3372 = vmatpush3.msra.mxu0 %v4157_v6  ;;  %3382 = vmatpush3.msra.mxu1 %v4143_v2 }
  0xf0   : > { %v1160_v44 = vpop.permute.xlu1 %1159  ;;  %3373 = vmatprep.subr.mxu0 %v4163_v7  ;;  %3383 = vmatprep.subr.mxu1 %v4153_v4 }
  0xf1   : > { %3350 = vmatprep.mubr.msk.f32.mxu0 %vm250_vm0, %v1160_v44  ;;  %3374 = vmatpush3.msra.mxu0 %v4163_v7  ;;  %v1839_v50 = vpop.permute.xlu0 %1838 }
  0xf2   : > { %3351 = vmatmul.mubr.msk.f32.gmra.mxu0 %vm250_vm0, %v1162_v35  ;;  %3384 = vmatpush3.msra.mxu1 %v4153_v4 }
  0xf3   : > { %3375 = vmatprep.mubr.msk.f32.mxu0 %vm250_vm0, %v4248_v14  ;;  %3385 = vmatprep.subr.mxu1 %v4157_v6  ;;  %v4487_v14 = vld [vmem:[%s5421_s3] ss:$0 sm:$0xff] }
  0xf4   : > { %v1281_v46 = vpop.permute.xlu1 %1280  ;;  %3395 = vmatprep.subr.mxu0 %v4143_v2  ;;  %3386 = vmatpush3.msra.mxu1 %v4157_v6 }
  0xf5   : > { %3364 = vmatprep.mubr.msk.f32.mxu1 %vm250_vm0, %v1281_v46  ;;  %3387 = vmatprep.subr.mxu1 %v4163_v7  ;;  %v1960_v52 = vpop.permute.xlu0 %1959 }
  0xf6   : > { %3376 = vmatmul.mubr.msk.f32.vlgmr.msra.gmra.mxu0 %vm250_vm0, %v4215_v11  ;;  %3365 = vmatmul.mubr.msk.f32.gmra.mxu1 %vm250_vm0, %v1283_v37 }
  0xf7   : > { %3396 = vmatpush3.msra.mxu0 %v4143_v2  ;;  %3378 = vmatprep.mubr.msk.f32.mxu0 %vm250_vm0, %v4258_v16 }
  0xf8   : > { %v1712_v48 = vpop.permute.xlu1 %1711  ;;  %3397 = vmatprep.subr.mxu0 %v4153_v4  ;;  %3388 = vmatpush3.msra.mxu1 %v4163_v7 }
  0xf9   : > { %3389 = vmatprep.mubr.msk.f32.mxu1 %vm250_vm0, %v1712_v48  ;;  %3398 = vmatpush3.msra.mxu0 %v4153_v4  ;;  %v2391_v54 = vpop.permute.xlu0 %2390 }
  0xfa   : > { %3379 = vmatmul.mubr.msk.f32.gmra.mxu0 %vm250_vm0, %v4225_v13  ;;  %3390 = vmatmul.mubr.msk.f32.vlgmr.msra.gmra.mxu1 %vm250_vm0, %v1714_v40 }
  0xfb   : > { %3399 = vmatprep.subr.mxu0 %v4157_v6  ;;  %3409 = vmatprep.subr.mxu1 %v4143_v2 }
  0xfc   : > { %v1716_v49 = vpop.permute.xlu1 %1715  ;;  %3400 = vmatpush3.msra.mxu0 %v4157_v6  ;;  %3410 = vmatpush3.msra.mxu1 %v4143_v2 }
  0xfd   : > { %3401 = vmatprep.subr.mxu0 %v4163_v7  ;;  %3392 = vmatprep.mubr.msk.f32.mxu1 %vm250_vm0, %v1716_v49  ;;  %v2395_v57 = vpop.permute.xlu0 %2394 }
  0xfe   : > { %3402 = vmatpush3.msra.mxu0 %v4163_v7  ;;  %3393 = vmatmul.mubr.msk.f32.gmra.mxu1 %vm250_vm0, %v1718_v42 }
  0xff   : > { %3411 = vmatprep.subr.mxu1 %v4153_v4  ;;  %3423 = vmatprep.subr.mxu0 %v4143_v2 }
 0x100   : > { %v1833_v51 = vpop.permute.xlu1 %1832  ;;  %3412 = vmatpush3.msra.mxu1 %v4153_v4 }
 0x101   : > { %3403 = vmatprep.mubr.msk.f32.mxu0 %vm250_vm0, %v1833_v51  ;;  %3413 = vmatprep.subr.mxu1 %v4157_v6  ;;  %v2512_v59 = vpop.permute.xlu0 %2511 }
 0x102   : > { %3404 = vmatmul.mubr.msk.f32.vlgmr.msra.gmra.mxu0 %vm250_vm0, %v1835_v45  ;;  %3414 = vmatpush3.msra.mxu1 %v4157_v6 }
 0x103   : > { %3415 = vmatprep.subr.mxu1 %v4163_v7  ;;  %3424 = vmatpush3.msra.mxu0 %v4143_v2 }
 0x104   : > { %v1954_v53 = vpop.permute.xlu1 %1953  ;;  %3416 = vmatpush3.msra.mxu1 %v4163_v7  ;;  %3425 = vmatprep.subr.mxu0 %v4153_v4 }
 0x105   : > { %3417 = vmatprep.mubr.msk.f32.mxu1 %vm250_vm0, %v1954_v53  ;;  %3426 = vmatpush3.msra.mxu0 %v4153_v4  ;;  %v2633_v1 = vpop.permute.xlu0 %2632 }
 0x106   : > { %3418 = vmatmul.mubr.msk.f32.vlgmr.msra.gmra.mxu1 %vm250_vm0, %v1956_v47  ;;  %3427 = vmatprep.subr.mxu0 %v4157_v6 }
 0x107   : > { %3437 = vmatprep.subr.mxu1 %v4143_v2  ;;  %3428 = vmatpush3.msra.mxu0 %v4157_v6 }
 0x108   : > { %v1837_v55 = vpop.permute.xlu1 %1836  ;;  %3438 = vmatpush3.msra.mxu1 %v4143_v2  ;;  %3429 = vmatprep.subr.mxu0 %v4163_v7 }
 0x109   : > { %3406 = vmatprep.mubr.msk.f32.mxu0 %vm250_vm0, %v1837_v55  ;;  %3439 = vmatprep.subr.mxu1 %v4153_v4  ;;  %v2516_v11 = vpop.permute.xlu0 %2515 }
 0x10a   : > { %3407 = vmatmul.mubr.msk.f32.gmra.mxu0 %vm250_vm0, %v1839_v50  ;;  %3440 = vmatpush3.msra.mxu1 %v4153_v4 }
 0x10b   : > { %3430 = vmatpush3.msra.mxu0 %v4163_v7  ;;  %3431 = vmatprep.mubr.msk.f32.mxu0 %vm250_vm0, %v4284_v18 }
 0x10c   : > { %v1958_v56 = vpop.permute.xlu1 %1957  ;;  %3441 = vmatprep.subr.mxu1 %v4157_v6  ;;  %3451 = vmatprep.subr.mxu0 %v4143_v2 }
 0x10d   : > { %3420 = vmatprep.mubr.msk.f32.mxu1 %vm250_vm0, %v1958_v56  ;;  %3442 = vmatpush3.msra.mxu1 %v4157_v6 }
 0x10e   : > { %3421 = vmatmul.mubr.msk.f32.gmra.mxu1 %vm250_vm0, %v1960_v52  ;;  %3432 = vmatmul.mubr.msk.f32.vlgmr.msra.gmra.mxu0 %vm250_vm0, %v4251_v15 }
 0x10f   : > { %3443 = vmatprep.subr.mxu1 %v4163_v7  ;;  %3452 = vmatpush3.msra.mxu0 %v4143_v2 }
 0x110   : > { %v2389_v58 = vpop.permute.xlu1 %2388  ;;  %3444 = vmatpush3.msra.mxu1 %v4163_v7  ;;  %3453 = vmatprep.subr.mxu0 %v4153_v4 }
 0x111   : > { %3445 = vmatprep.mubr.msk.f32.mxu1 %vm250_vm0, %v2389_v58  ;;  %3434 = vmatprep.mubr.msk.f32.mxu0 %vm250_vm0, %v4289_v19 }
 0x112   : > { %3446 = vmatmul.mubr.msk.f32.vlgmr.msra.gmra.mxu1 %vm250_vm0, %v2391_v54  ;;  %3454 = vmatpush3.msra.mxu0 %v4153_v4 }
 0x113   : > { %3435 = vmatmul.mubr.msk.f32.gmra.mxu0 %vm250_vm0, %v4261_v17  ;;  %3455 = vmatprep.subr.mxu0 %v4157_v6 }
 0x114   : > { %v2393_v60 = vpop.permute.xlu1 %2392  ;;  %3456 = vmatpush3.msra.mxu0 %v4157_v6  ;;  %3465 = vmatprep.subr.mxu1 %v4143_v2 }
 0x115   : > { %3448 = vmatprep.mubr.msk.f32.mxu1 %vm250_vm0, %v2393_v60  ;;  %3457 = vmatprep.subr.mxu0 %v4163_v7  ;;  %v3265_v61 = vpop.f32.mrf.mxu0 }
 0x116   : > { %3449 = vmatmul.mubr.msk.f32.gmra.mxu1 %vm250_vm0, %v2395_v57  ;;  %3458 = vmatpush3.msra.mxu0 %v4163_v7  ;;  %v335_v0 = vadd.f32 %v3265_v61, %v4464_v62 }
 0x117   : > { %3466 = vmatpush3.msra.mxu1 %v4143_v2  ;;  %v329_v3 = vpop.f32.mrf.mxu0 }
 0x118   : > { %v2510_v63 = vpop.permute.xlu1 %2509  ;;  %3467 = vmatprep.subr.mxu1 %v4153_v4  ;;  %3545 = vtanh.f32 %v335_v0  ;;  %v330_v2 = vadd.f32 %v4464_v62, %v329_v3 }
 0x119   : > { %3459 = vmatprep.mubr.msk.f32.mxu0 %vm250_vm0, %v2510_v63  ;;  %3468 = vmatpush3.msra.mxu1 %v4153_v4  ;;  %v3268_v5 = vpop.f32.mrf.mxu0 }
 0x11a   : > { %3460 = vmatmul.mubr.msk.f32.vlgmr.msra.gmra.mxu0 %vm250_vm0, %v2512_v59  ;;  %3469 = vmatprep.subr.mxu1 %v4157_v6  ;;  %3547 = vtanh.f32 %v330_v2  ;;  %v345_v9 = vadd.f32 %v3268_v5, %v4464_v62 }
 0x11b   : > { %3470 = vmatpush3.msra.mxu1 %v4157_v6  ;;  %v339_v4 = vpop.f32.mrf.mxu0  ;;  %v2637_v6 = vpop.permute.xlu0 %2636 }
 0x11c   : > { %v2631_v8 = vpop.permute.xlu1 %2630  ;;  %3471 = vmatprep.subr.mxu1 %v4163_v7  ;;  %3549 = vtanh.f32 %v345_v9  ;;  %v340_v10 = vadd.f32 %v4464_v62, %v339_v4 }
 0x11d   : > { %3472 = vmatpush3.msra.mxu1 %v4163_v7  ;;  %3473 = vmatprep.mubr.msk.f32.mxu1 %vm250_vm0, %v2631_v8 }
 0x11e   : > { %3474 = vmatmul.mubr.msk.f32.vlgmr.msra.gmra.mxu1 %vm250_vm0, %v2633_v1  ;;  %3551 = vtanh.f32 %v340_v10 }
 0x120   : > { %v2514_v12 = vpop.permute.xlu1 %2513 }
 0x121   : > { %3462 = vmatprep.mubr.msk.f32.mxu0 %vm250_vm0, %v2514_v12 }
 0x122   : > { %3463 = vmatmul.mubr.msk.f32.gmra.mxu0 %vm250_vm0, %v2516_v11 }
 0x124   : > { %v2635_v13 = vpop.permute.xlu1 %2634 }
 0x125   : > { %3476 = vmatprep.mubr.msk.f32.mxu1 %vm250_vm0, %v2635_v13  ;;  %v3546_v7 = vpop.eup %3545 }
 0x126   : > { %3477 = vmatmul.mubr.msk.f32.gmra.mxu1 %vm250_vm0, %v2637_v6  ;;  %v359_v15 = vmul.f32 %v3546_v7, %v4487_v14 }
 0x127   : > { %v3548_v16 = vpop.eup %3547 }
 0x128   : > { %v365_v17 = vsel %vm250_vm0, %v359_v15, 0.0  ;;  %v358_v18 = vmul.f32 %v3548_v16, %v4487_v14 }
 0x129   : > { %v3550_v19 = vpop.eup %3549  ;;  %366 = vadd.xlane.f32.xlu0 %v365_v17 }
 0x12a   : > { %v361_v20 = vmul.f32 %v3550_v19, %v4487_v14  ;;  %v362_v21 = vsel %vm250_vm0, %v358_v18, 0.0 }
 0x12b   : > { %v3552_v22 = vpop.eup %3551 }
 0x12c   : > { %v371_v23 = vsel %vm250_vm0, %v361_v20, 0.0  ;;  %v360_v24 = vmul.f32 %v3552_v22, %v4487_v14 }
 0x12d   : > { %372 = vadd.xlane.f32.xlu1 %v371_v23  ;;  %363 = vadd.xlane.f32.xlu0 %v362_v21 }
 0x12e   : > { %v368_v25 = vsel %vm250_vm0, %v360_v24, 0.0 }
 0x131   : > { %369 = vadd.xlane.f32.xlu1 %v368_v25 }
 0x17f   : > { %v3279_v26 = vpop.f32.mrf.mxu1 }
 0x180   : > { %v462_v27 = vadd.f32 %v3279_v26, %v4464_v62 }
 0x181   : > { %v456_v28 = vpop.f32.mrf.mxu1 }
 0x182   : > { %3553 = vtanh.f32 %v462_v27  ;;  %v457_v29 = vadd.f32 %v4464_v62, %v456_v28 }
 0x184   : > { %3555 = vtanh.f32 %v457_v29 }
 0x185   : > { %v3282_v30 = vpop.f32.mrf.mxu1 }
 0x186   : > { %v472_v31 = vadd.f32 %v3282_v30, %v4464_v62 }
 0x187   : > { %v466_v37 = vpop.f32.mrf.mxu1 }
 0x188   : > { %v467_v43 = vadd.f32 %v4464_v62, %v466_v37 }
 0x189   : > { %v3293_v32 = vpop.f32.mrf.mxu0 }
 0x18a   : > { %v583_v33 = vadd.f32 %v3293_v32, %v4464_v62 }
 0x18b   : > { %v577_v34 = vpop.f32.mrf.mxu0 }
 0x18c   : > { %3557 = vtanh.f32 %v583_v33  ;;  %v578_v35 = vadd.f32 %v4464_v62, %v577_v34 }
 0x18d   : > { %3559 = vtanh.f32 %v472_v31 }
 0x18e   : > { %3561 = vtanh.f32 %v578_v35 }
 0x18f   : > { %v3554_v36 = vpop.eup %3553 }
 0x190   : > { %v480_v38 = vmul.f32 %v3554_v36, %v4487_v14 }
 0x191   : > { %v3556_v39 = vpop.eup %3555  ;;  %v3296_v40 = vpop.f32.mrf.mxu0 }
 0x192   : > { %v486_v41 = vsel %vm250_vm0, %v480_v38, 0.0  ;;  %v479_v42 = vmul.f32 %v3556_v39, %v4487_v14  ;;  %v593_v44 = vadd.f32 %v3296_v40, %v4464_v62 }
 0x193   : > { %487 = vadd.xlane.f32.xlu1 %v486_v41  ;;  %v587_v45 = vpop.f32.mrf.mxu0 }
 0x194   : > { %v483_v46 = vsel %vm250_vm0, %v479_v42, 0.0  ;;  %3563 = vtanh.f32 %v593_v44  ;;  %v588_v49 = vadd.f32 %v4464_v62, %v587_v45 }
 0x195   : > { %484 = vadd.xlane.f32.xlu0 %v483_v46  ;;  %v3307_v47 = vpop.f32.mrf.mxu1  ;;  %v3321_v48 = vpop.f32.mrf.mxu0  ;;  %3565 = vtanh.f32 %v467_v43 }
 0x196   : > { %v704_v50 = vadd.f32 %v3307_v47, %v4464_v62  ;;  %v1001_v51 = vadd.f32 %v3321_v48, %v4464_v62 }
 0x197   : > { %v698_v52 = vpop.f32.mrf.mxu1  ;;  %v995_v58 = vpop.f32.mrf.mxu0 }
 0x198   : > { %3567 = vtanh.f32 %v704_v50  ;;  %v699_v55 = vadd.f32 %v4464_v62, %v698_v52  ;;  %v996_v0 = vadd.f32 %v4464_v62, %v995_v58 }
 0x199   : > { %v3558_v53 = vpop.eup %3557  ;;  %3569 = vtanh.f32 %v1001_v51 }
 0x19a   : > { %v3560_v54 = vpop.eup %3559  ;;  %3571 = vtanh.f32 %v588_v49  ;;  %v601_v56 = vmul.f32 %v3558_v53, %v4487_v14 }
 0x19b   : > { %v3562_v57 = vpop.eup %3561  ;;  %3573 = vtanh.f32 %v699_v55  ;;  %v482_v1 = vmul.f32 %v3560_v54, %v4487_v14  ;;  %v3324_v4 = vpop.f32.mrf.mxu0 }
 0x19c   : > { %v607_v59 = vsel %vm250_vm0, %v601_v56, 0.0  ;;  %v600_v60 = vmul.f32 %v3562_v57, %v4487_v14  ;;  %3575 = vtanh.f32 %v996_v0  ;;  %v1011_v6 = vadd.f32 %v3324_v4, %v4464_v62 }
 0x19d   : > { %608 = vadd.xlane.f32.xlu1 %v607_v59  ;;  %v3310_v61 = vpop.f32.mrf.mxu1  ;;  %v492_v9 = vsel %vm250_vm0, %v482_v1, 0.0  ;;  %v1005_v17 = vpop.f32.mrf.mxu0 }
 0x19e   : > { %v604_v63 = vsel %vm250_vm0, %v600_v60, 0.0  ;;  %v714_v2 = vadd.f32 %v3310_v61, %v4464_v62  ;;  %v1006_v33 = vadd.f32 %v4464_v62, %v1005_v17 }
 0x19f   : > { %605 = vadd.xlane.f32.xlu0 %v604_v63  ;;  %v708_v3 = vpop.f32.mrf.mxu1 }
 0x1a0   : > { %3577 = vtanh.f32 %v714_v2  ;;  %v709_v25 = vadd.f32 %v4464_v62, %v708_v3 }
 0x1a1   : > { %v3564_v5 = vpop.eup %3563 }
 0x1a2   : > { %v3335_v8 = vpop.f32.mrf.mxu1  ;;  %v603_v10 = vmul.f32 %v3564_v5, %v4487_v14  ;;  %v3566_v11 = vpop.eup %3565 }
 0x1a3   : > { %v1122_v12 = vadd.f32 %v3335_v8, %v4464_v62  ;;  %493 = vadd.xlane.f32.xlu0 %v492_v9  ;;  %v481_v19 = vmul.f32 %v3566_v11, %v4487_v14 }
 0x1a4   : > { %v613_v13 = vsel %vm250_vm0, %v603_v10, 0.0  ;;  %v1116_v7 = vpop.f32.mrf.mxu1 }
 0x1a5   : > { %v3568_v15 = vpop.eup %3567  ;;  %3579 = vtanh.f32 %v1122_v12  ;;  %v489_v27 = vsel %vm250_vm0, %v481_v19, 0.0  ;;  %v1117_v42 = vadd.f32 %v4464_v62, %v1116_v7 }
 0x1a6   : > { %v3570_v16 = vpop.eup %3569  ;;  %v722_v18 = vmul.f32 %v3568_v15, %v4487_v14  ;;  %v3338_v20 = vpop.f32.mrf.mxu1  ;;  %3581 = vtanh.f32 %v1011_v6 }
 0x1a7   : > { %v3572_v21 = vpop.eup %3571  ;;  %614 = vadd.xlane.f32.xlu0 %v613_v13  ;;  %v1132_v22 = vadd.f32 %v3338_v20, %v4464_v62  ;;  %v1019_v23 = vmul.f32 %v3570_v16, %v4487_v14 }
 0x1a8   : > { %v728_v24 = vsel %vm250_vm0, %v722_v18, 0.0  ;;  %v602_v28 = vmul.f32 %v3572_v21, %v4487_v14  ;;  %v1126_v30 = vpop.f32.mrf.mxu1  ;;  %v3574_v31 = vpop.eup %3573 }
 0x1a9   : > { %729 = vadd.xlane.f32.xlu1 %v728_v24  ;;  %v1025_v29 = vsel %vm250_vm0, %v1019_v23, 0.0  ;;  %3583 = vtanh.f32 %v1132_v22  ;;  %v721_v36 = vmul.f32 %v3574_v31, %v4487_v14  ;;  %v3576_v38 = vpop.eup %3575  ;;  %v1127_v3 = vadd.f32 %v4464_v62, %v1126_v30 }
 0x1aa   : > { %v3349_v26 = vpop.f32.mrf.mxu0  ;;  %v610_v34 = vsel %vm250_vm0, %v602_v28, 0.0  ;;  %v1018_v45 = vmul.f32 %v3576_v38, %v4487_v14 }
 0x1ab   : > { %v1243_v32 = vadd.f32 %v3349_v26, %v4464_v62  ;;  %490 = vadd.xlane.f32.xlu0 %v489_v27  ;;  %v725_v44 = vsel %vm250_vm0, %v721_v36, 0.0 }
 0x1ac   : > { %v1237_v35 = vpop.f32.mrf.mxu0  ;;  %v1022_v54 = vsel %vm250_vm0, %v1018_v45, 0.0 }
 0x1ad   : > { %3585 = vtanh.f32 %v1243_v32  ;;  %1026 = vadd.xlane.f32.xlu1 %v1025_v29  ;;  %v3578_v40 = vpop.eup %3577  ;;  %v1238_v53 = vadd.f32 %v4464_v62, %v1237_v35 }
 0x1ae   : > { %3587 = vtanh.f32 %v709_v25  ;;  %v3363_v37 = vpop.f32.mrf.mxu1  ;;  %v724_v50 = vmul.f32 %v3578_v40, %v4487_v14 }
 0x1af   : > { %611 = vadd.xlane.f32.xlu0 %v610_v34  ;;  %v1364_v39 = vadd.f32 %v3363_v37, %v4464_v62  ;;  %3589 = vtanh.f32 %v1006_v33 }
 0x1b0   : > { %v1358_v46 = vpop.f32.mrf.mxu1  ;;  %v734_v60 = vsel %vm250_vm0, %v724_v50, 0.0 }
 0x1b1   : > { %3591 = vtanh.f32 %v1364_v39  ;;  %v1359_v21 = vadd.f32 %v4464_v62, %v1358_v46 }
 0x1b2   : > { %v3580_v41 = vpop.eup %3579  ;;  %v3352_v43 = vpop.f32.mrf.mxu0 }
 0x1b3   : > { %v1253_v47 = vadd.f32 %v3352_v43, %v4464_v62  ;;  %726 = vadd.xlane.f32.xlu0 %v725_v44  ;;  %v1140_v48 = vmul.f32 %v3580_v41, %v4487_v14  ;;  %v3582_v51 = vpop.eup %3581 }
 0x1b4   : > { %v1247_v49 = vpop.f32.mrf.mxu0  ;;  %v1021_v61 = vmul.f32 %v3582_v51, %v4487_v14 }
 0x1b5   : > { %3593 = vtanh.f32 %v1253_v47  ;;  %v1146_v52 = vsel %vm250_vm0, %v1140_v48, 0.0  ;;  %v1248_v13 = vadd.f32 %v4464_v62, %v1247_v49 }
 0x1b6   : > { %3595 = vtanh.f32 %v1117_v42  ;;  %1147 = vadd.xlane.f32.xlu1 %v1146_v52  ;;  %v3377_v55 = vpop.f32.mrf.mxu0  ;;  %v3366_v56 = vpop.f32.mrf.mxu1  ;;  %v1031_v11 = vsel %vm250_vm0, %v1021_v61, 0.0 }
 0x1b7   : > { %1023 = vadd.xlane.f32.xlu0 %v1022_v54  ;;  %v1678_v57 = vadd.f32 %v3377_v55, %v4464_v62  ;;  %v1374_v58 = vadd.f32 %v3366_v56, %v4464_v62  ;;  %v3584_v59 = vpop.eup %3583 }
 0x1b8   : > { %v4551_v63 = vpop.f32.mrf.mxu1  ;;  %v1672_v0 = vpop.f32.mrf.mxu0  ;;  %v1142_v10 = vmul.f32 %v3584_v59, %v4487_v14 }
 0x1b9   : > { %3597 = vtanh.f32 %v1678_v57  ;;  %v1673_v33 = vadd.f32 %v4464_v62, %v1672_v0  ;;  %v1369_v54 = vadd.f32 %v4464_v62, %v4551_v63 }
 0x1ba   : > { %v3586_v1 = vpop.eup %3585  ;;  %3599 = vtanh.f32 %v1238_v53  ;;  %v3380_v2 = vpop.f32.mrf.mxu0  ;;  %v1152_v17 = vsel %vm250_vm0, %v1142_v10, 0.0 }
 0x1bb   : > { %v3391_v5 = vpop.f32.mrf.mxu1  ;;  %v3588_v8 = vpop.eup %3587  ;;  %735 = vadd.xlane.f32.xlu0 %v734_v60  ;;  %3601 = vtanh.f32 %v1374_v58  ;;  %v1261_v9 = vmul.f32 %v3586_v1, %v4487_v14  ;;  %v1688_v42 = vadd.f32 %v3380_v2, %v4464_v62 }
 0x1bc   : > { %v1799_v4 = vadd.f32 %v3391_v5, %v4464_v62  ;;  %3603 = vtanh.f32 %v1127_v3  ;;  %v723_v7 = vmul.f32 %v3588_v8, %v4487_v14  ;;  %v4563_v15 = vpop.f32.mrf.mxu0  ;;  %v3590_v16 = vpop.eup %3589 }
 0x1bd   : > { %v4558_v12 = vpop.f32.mrf.mxu1  ;;  %v1267_v6 = vsel %vm250_vm0, %v1261_v9, 0.0  ;;  %v1020_v24 = vmul.f32 %v3590_v16, %v4487_v14  ;;  %v1683_v2 = vadd.f32 %v4464_v62, %v4563_v15 }
 0x1be   : > { %1268 = vadd.xlane.f32.xlu1 %v1267_v6  ;;  %3605 = vtanh.f32 %v1799_v4  ;;  %v3592_v18 = vpop.eup %3591  ;;  %v731_v22 = vsel %vm250_vm0, %v723_v7, 0.0  ;;  %v1794_v15 = vadd.f32 %v4464_v62, %v4558_v12 }
 0x1bf   : > { %1032 = vadd.xlane.f32.xlu0 %v1031_v11  ;;  %v3394_v19 = vpop.f32.mrf.mxu1  ;;  %3607 = vtanh.f32 %v1248_v13  ;;  %v1382_v30 = vmul.f32 %v3592_v18, %v4487_v14  ;;  %v1028_v34 = vsel %vm250_vm0, %v1020_v24, 0.0 }
 0x1c0   : > { %v1809_v29 = vadd.f32 %v3394_v19, %v4464_v62 }
 0x1c1   : > { %v4569_v25 = vpop.f32.mrf.mxu1  ;;  %v1388_v39 = vsel %vm250_vm0, %v1382_v30, 0.0 }
 0x1c2   : > { %v3594_v20 = vpop.eup %3593  ;;  %1153 = vadd.xlane.f32.xlu1 %v1152_v17  ;;  %v3405_v23 = vpop.f32.mrf.mxu0 }
 0x1c3   : > { %v3596_v26 = vpop.eup %3595  ;;  %732 = vadd.xlane.f32.xlu0 %v731_v22  ;;  %v1920_v27 = vadd.f32 %v3405_v23, %v4464_v62  ;;  %v1263_v28 = vmul.f32 %v3594_v20, %v4487_v14 }
 0x1c4   : > { %v1139_v35 = vmul.f32 %v3596_v26, %v4487_v14  ;;  %v4579_v36 = vpop.f32.mrf.mxu0 }
 0x1c5   : > { %3609 = vtanh.f32 %v1920_v27  ;;  %v1273_v31 = vsel %vm250_vm0, %v1263_v28, 0.0  ;;  %v1915_v12 = vadd.f32 %v4464_v62, %v4579_v36  ;;  %v1804_v36 = vadd.f32 %v4464_v62, %v4569_v25 }
 0x1c6   : > { %v3598_v32 = vpop.eup %3597  ;;  %3611 = vtanh.f32 %v1359_v21  ;;  %1274 = vadd.xlane.f32.xlu1 %v1273_v31  ;;  %v3419_v37 = vpop.f32.mrf.mxu1  ;;  %v1143_v43 = vsel %vm250_vm0, %v1139_v35, 0.0 }
 0x1c7   : > { %v3600_v38 = vpop.eup %3599  ;;  %1029 = vadd.xlane.f32.xlu0 %v1028_v34  ;;  %3613 = vtanh.f32 %v1809_v29  ;;  %v1696_v40 = vmul.f32 %v3598_v32, %v4487_v14  ;;  %v2041_v50 = vadd.f32 %v3419_v37, %v4464_v62 }
 0x1c8   : > { %v3602_v41 = vpop.eup %3601  ;;  %3615 = vtanh.f32 %v1673_v33  ;;  %v1260_v45 = vmul.f32 %v3600_v38, %v4487_v14  ;;  %v4586_v46 = vpop.f32.mrf.mxu1 }
 0x1c9   : > { %v3604_v47 = vpop.eup %3603  ;;  %v1702_v49 = vsel %vm250_vm0, %v1696_v40, 0.0  ;;  %v1384_v51 = vmul.f32 %v3602_v41, %v4487_v14  ;;  %3617 = vtanh.f32 %v1688_v42 }
 0x1ca   : > { %1389 = vadd.xlane.f32.xlu1 %v1388_v39  ;;  %v3408_v44 = vpop.f32.mrf.mxu0  ;;  %v1264_v55 = vsel %vm250_vm0, %v1260_v45, 0.0  ;;  %v1141_v56 = vmul.f32 %v3604_v47, %v4487_v14 }
 0x1cb   : > { %1144 = vadd.xlane.f32.xlu0 %v1143_v43  ;;  %v1930_v48 = vadd.f32 %v3408_v44, %v4464_v62  ;;  %v3606_v52 = vpop.eup %3605  ;;  %v1394_v60 = vsel %vm250_vm0, %v1384_v51, 0.0 }
 0x1cc   : > { %v4592_v53 = vpop.f32.mrf.mxu0  ;;  %v3608_v59 = vpop.eup %3607  ;;  %v1817_v0 = vmul.f32 %v3606_v52, %v4487_v14  ;;  %v1149_v5 = vsel %vm250_vm0, %v1141_v56, 0.0 }
 0x1cd   : > { %3619 = vtanh.f32 %v1930_v48  ;;  %v1262_v8 = vmul.f32 %v3608_v59, %v4487_v14  ;;  %v1925_v25 = vadd.f32 %v4464_v62, %v4592_v53  ;;  %v2036_v53 = vadd.f32 %v4464_v62, %v4586_v46 }
 0x1ce   : > { %1703 = vadd.xlane.f32.xlu1 %v1702_v49  ;;  %v3422_v57 = vpop.f32.mrf.mxu1  ;;  %v3433_v58 = vpop.f32.mrf.mxu0  ;;  %3621 = vtanh.f32 %v2041_v50  ;;  %v1823_v10 = vsel %vm250_vm0, %v1817_v0, 0.0 }
 0x1cf   : > { %1265 = vadd.xlane.f32.xlu0 %v1264_v55  ;;  %v2051_v61 = vadd.f32 %v3422_v57, %v4464_v62  ;;  %3623 = vtanh.f32 %v1369_v54  ;;  %v2355_v11 = vadd.f32 %v3433_v58, %v4464_v62  ;;  %v1270_v17 = vsel %vm250_vm0, %v1262_v8, 0.0 }
 0x1d0   : > { %v4601_v1 = vpop.f32.mrf.mxu1  ;;  %v4603_v3 = vpop.f32.mrf.mxu0 }
 0x1d1   : > { %3625 = vtanh.f32 %v2051_v61  ;;  %v2046_v46 = vadd.f32 %v4464_v62, %v4601_v1 }
 0x1d2   : > { %v3610_v63 = vpop.eup %3609  ;;  %1395 = vadd.xlane.f32.xlu1 %v1394_v60  ;;  %v3447_v9 = vpop.f32.mrf.mxu1  ;;  %3627 = vtanh.f32 %v1683_v2 }
 0x1d3   : > { %v3612_v4 = vpop.eup %3611  ;;  %1150 = vadd.xlane.f32.xlu0 %v1149_v5  ;;  %v1938_v6 = vmul.f32 %v3610_v63, %v4487_v14  ;;  %v4612_v13 = vpop.f32.mrf.mxu0  ;;  %3629 = vtanh.f32 %v2355_v11  ;;  %v2476_v22 = vadd.f32 %v3447_v9, %v4464_v62 }
 0x1d4   : > { %v3614_v7 = vpop.eup %3613  ;;  %v4614_v16 = vpop.f32.mrf.mxu1  ;;  %v1381_v18 = vmul.f32 %v3612_v4, %v4487_v14  ;;  %3631 = vtanh.f32 %v1794_v15 }
 0x1d5   : > { %v4620_v19 = vpop.f32.mrf.mxu0  ;;  %v3616_v20 = vpop.eup %3615  ;;  %v1944_v21 = vsel %vm250_vm0, %v1938_v6, 0.0  ;;  %v1819_v23 = vmul.f32 %v3614_v7, %v4487_v14  ;;  %3633 = vtanh.f32 %v2476_v22  ;;  %v2350_v7 = vadd.f32 %v4464_v62, %v4603_v3 }
 0x1d6   : > { %1824 = vadd.xlane.f32.xlu1 %v1823_v10  ;;  %v3450_v24 = vpop.f32.mrf.mxu1  ;;  %v3618_v26 = vpop.eup %3617  ;;  %v1385_v28 = vsel %vm250_vm0, %v1381_v18, 0.0  ;;  %v1695_v29 = vmul.f32 %v3616_v20, %v4487_v14  ;;  %3635 = vtanh.f32 %v1915_v12  ;;  %v2360_v22 = vadd.f32 %v4464_v62, %v4620_v19 }
 0x1d7   : > { %1271 = vadd.xlane.f32.xlu0 %v1270_v17  ;;  %v1829_v31 = vsel %vm250_vm0, %v1819_v23, 0.0  ;;  %v2486_v32 = vadd.f32 %v3450_v24, %v4464_v62  ;;  %v1698_v35 = vmul.f32 %v3618_v26, %v4487_v14 }
 0x1d8   : > { %v1699_v37 = vsel %vm250_vm0, %v1695_v29, 0.0  ;;  %v4638_v39 = vpop.f32.mrf.mxu1 }
 0x1d9   : > { %3637 = vtanh.f32 %v2486_v32  ;;  %v1708_v45 = vsel %vm250_vm0, %v1698_v35, 0.0 }
 0x1da   : > { %v3620_v27 = vpop.eup %3619  ;;  %1945 = vadd.xlane.f32.xlu1 %v1944_v21  ;;  %v3461_v30 = vpop.f32.mrf.mxu0  ;;  %3639 = vtanh.f32 %v1804_v36 }
 0x1db   : > { %1386 = vadd.xlane.f32.xlu0 %v1385_v28  ;;  %v1940_v33 = vmul.f32 %v3620_v27, %v4487_v14  ;;  %v3622_v34 = vpop.eup %3621  ;;  %v2597_v42 = vadd.f32 %v3461_v30, %v4464_v62  ;;  %v2365_v28 = vadd.f32 %v4612_v13, %v4464_v62 }
 0x1dc   : > { %v4636_v38 = vpop.f32.mrf.mxu0  ;;  %v3624_v40 = vpop.eup %3623  ;;  %v2059_v43 = vmul.f32 %v3622_v34, %v4487_v14  ;;  %v2471_v34 = vadd.f32 %v4464_v62, %v4614_v16 }
 0x1dd   : > { %v1950_v41 = vsel %vm250_vm0, %v1940_v33, 0.0  ;;  %v1383_v47 = vmul.f32 %v3624_v40, %v4487_v14  ;;  %3641 = vtanh.f32 %v2597_v42  ;;  %v2481_v42 = vadd.f32 %v4464_v62, %v4638_v39 }
 0x1de   : > { %1830 = vadd.xlane.f32.xlu1 %v1829_v31  ;;  %v3626_v44 = vpop.eup %3625  ;;  %v3475_v49 = vpop.f32.mrf.mxu1  ;;  %v2065_v51 = vsel %vm250_vm0, %v2059_v43, 0.0  ;;  %3643 = vtanh.f32 %v1925_v25 }
 0x1df   : > { %1700 = vadd.xlane.f32.xlu0 %v1699_v37  ;;  %v3628_v50 = vpop.eup %3627  ;;  %v2061_v54 = vmul.f32 %v3626_v44, %v4487_v14  ;;  %v1391_v57 = vsel %vm250_vm0, %v1383_v47, 0.0  ;;  %v2718_v61 = vadd.f32 %v3475_v49, %v4464_v62  ;;  %v2592_v47 = vadd.f32 %v4464_v62, %v4636_v38 }
 0x1e0   : > { %v3630_v55 = vpop.eup %3629  ;;  %v4650_v56 = vpop.f32.mrf.mxu1  ;;  %v1697_v58 = vmul.f32 %v3628_v50, %v4487_v14 }
 0x1e1   : > { %v3632_v59 = vpop.eup %3631  ;;  %v2071_v60 = vsel %vm250_vm0, %v2061_v54, 0.0  ;;  %v2373_v0 = vmul.f32 %v3630_v55, %v4487_v14 }
 0x1e2   : > { %1951 = vadd.xlane.f32.xlu1 %v1950_v41  ;;  %v3464_v48 = vpop.f32.mrf.mxu0  ;;  %v3634_v63 = vpop.eup %3633  ;;  %v1705_v5 = vsel %vm250_vm0, %v1697_v58, 0.0  ;;  %v1816_v8 = vmul.f32 %v3632_v59, %v4487_v14 }
 0x1e3   : > { %1709 = vadd.xlane.f32.xlu0 %v1708_v45  ;;  %v2607_v52 = vadd.f32 %v3464_v48, %v4464_v62  ;;  %v3636_v9 = vpop.eup %3635  ;;  %v2379_v4 = vsel %vm250_vm0, %v2373_v0, 0.0  ;;  %v2494_v10 = vmul.f32 %v3634_v63, %v4487_v14 }
 0x1e4   : > { %v1820_v1 = vsel %vm250_vm0, %v1816_v8, 0.0  ;;  %v1937_v15 = vmul.f32 %v3636_v9, %v4487_v14  ;;  %v2601_v50 = vpop.f32.mrf.mxu0 }
 0x1e5   : > { %3645 = vtanh.f32 %v2607_v52  ;;  %v2500_v18 = vsel %vm250_vm0, %v2494_v10, 0.0  ;;  %v2602_v54 = vadd.f32 %v4464_v62, %v2601_v50  ;;  %v367_v10 = vpop.xlane.xlu0 %366 }
 0x1e6   : > { %2066 = vadd.xlane.f32.xlu1 %v2065_v51  ;;  %v3478_v2 = vpop.f32.mrf.mxu1  ;;  %3647 = vtanh.f32 %v2036_v53  ;;  %v3638_v6 = vpop.eup %3637  ;;  %v1941_v3 = vsel %vm250_vm0, %v1937_v15, 0.0  ;;  %v2713_v53 = vadd.f32 %v4464_v62, %v4650_v56 }
 0x1e7   : > { %1392 = vadd.xlane.f32.xlu0 %v1391_v57  ;;  %3649 = vtanh.f32 %v2718_v61  ;;  %v2728_v11 = vadd.f32 %v3478_v2, %v4464_v62  ;;  %v3640_v17 = vpop.eup %3639  ;;  %v2496_v20 = vmul.f32 %v3638_v6, %v4487_v14 }
 0x1e8   : > { %3651 = vtanh.f32 %v2046_v46  ;;  %v1818_v23 = vmul.f32 %v3640_v17, %v4487_v14 }
 0x1e9   : > { %3653 = vtanh.f32 %v2728_v11  ;;  %v2506_v26 = vsel %vm250_vm0, %v2496_v20, 0.0 }
 0x1ea   : > { %2072 = vadd.xlane.f32.xlu1 %v2071_v60  ;;  %v3642_v21 = vpop.eup %3641  ;;  %3655 = vtanh.f32 %v2350_v7  ;;  %v1826_v29 = vsel %vm250_vm0, %v1818_v23, 0.0  ;;  %v2722_v60 = vpop.f32.mrf.mxu1 }
 0x1eb   : > { %1706 = vadd.xlane.f32.xlu0 %v1705_v5  ;;  %v3644_v24 = vpop.eup %3643  ;;  %v2615_v27 = vmul.f32 %v3642_v21, %v4487_v14  ;;  %3657 = vtanh.f32 %v2360_v22  ;;  %v2723_v0 = vadd.f32 %v4464_v62, %v2722_v60  ;;  %v4717_v7 = vpop.xlane.xlu1 %372 }
 0x1ec   : > { %v1939_v19 = vmul.f32 %v3644_v24, %v4487_v14  ;;  %3659 = vtanh.f32 %v2365_v28 }
 0x1ed   : > { %v2621_v31 = vsel %vm250_vm0, %v2615_v27, 0.0  ;;  %3661 = vtanh.f32 %v2471_v34 }
 0x1ee   : > { %2380 = vadd.xlane.f32.xlu1 %v2379_v4  ;;  %v1947_v13 = vsel %vm250_vm0, %v1939_v19, 0.0  ;;  %3663 = vtanh.f32 %v2481_v42 }
 0x1ef   : > { %1821 = vadd.xlane.f32.xlu0 %v1820_v1  ;;  %3665 = vtanh.f32 %v2592_v47  ;;  %v364_v1 = vpop.xlane.xlu0 %363  ;;  %v4723_v22 = vpop.xlane.xlu1 %369 }
 0x1f0   : > { %3667 = vtanh.f32 %v2602_v54 }
 0x1f1   : > { %3669 = vtanh.f32 %v2713_v53 }
 0x1f2   : > { %2501 = vadd.xlane.f32.xlu1 %v2500_v18  ;;  %v3646_v12 = vpop.eup %3645  ;;  %3671 = vtanh.f32 %v2723_v0 }
 0x1f3   : > { %1942 = vadd.xlane.f32.xlu0 %v1941_v3  ;;  %v3648_v30 = vpop.eup %3647  ;;  %v2617_v32 = vmul.f32 %v3646_v12, %v4487_v14 }
 0x1f4   : > { %v3650_v33 = vpop.eup %3649  ;;  %v2058_v35 = vmul.f32 %v3648_v30, %v4487_v14 }
 0x1f5   : > { %v3652_v36 = vpop.eup %3651  ;;  %v2627_v37 = vsel %vm250_vm0, %v2617_v32, 0.0  ;;  %v2736_v40 = vmul.f32 %v3650_v33, %v4487_v14 }
 0x1f6   : > { %2507 = vadd.xlane.f32.xlu1 %v2506_v26  ;;  %v3654_v41 = vpop.eup %3653  ;;  %v2062_v16 = vsel %vm250_vm0, %v2058_v35, 0.0  ;;  %v2060_v43 = vmul.f32 %v3652_v36, %v4487_v14 }
 0x1f7   : > { %1827 = vadd.xlane.f32.xlu0 %v1826_v29  ;;  %v3656_v44 = vpop.eup %3655  ;;  %v2742_v45 = vsel %vm250_vm0, %v2736_v40, 0.0  ;;  %v2738_v25 = vmul.f32 %v3654_v41, %v4487_v14 }
 0x1f8   : > { %v2068_v48 = vsel %vm250_vm0, %v2060_v43, 0.0  ;;  %v2372_v39 = vmul.f32 %v3656_v44, %v4487_v14  ;;  %v3658_v49 = vpop.eup %3657 }
 0x1f9   : > { %v2748_v51 = vsel %vm250_vm0, %v2738_v25, 0.0  ;;  %v2374_v55 = vmul.f32 %v3658_v49, %v4487_v14  ;;  %v3660_v38 = vpop.eup %3659 }
 0x1fa   : > { %2622 = vadd.xlane.f32.xlu1 %v2621_v31  ;;  %v2376_v52 = vsel %vm250_vm0, %v2372_v39, 0.0  ;;  %v2375_v58 = vmul.f32 %v3660_v38, %v4487_v14  ;;  %v3662_v59 = vpop.eup %3661 }
 0x1fb   : > { %1948 = vadd.xlane.f32.xlu0 %v1947_v13  ;;  %v2382_v57 = vsel %vm250_vm0, %v2374_v55, 0.0  ;;  %v2493_v63 = vmul.f32 %v3662_v59, %v4487_v14  ;;  %v3664_v2 = vpop.eup %3663 }
 0x1fc   : > { %v2385_v61 = vsel %vm250_vm0, %v2375_v58, 0.0  ;;  %v2495_v46 = vmul.f32 %v3664_v2, %v4487_v14  ;;  %v3666_v5 = vpop.eup %3665 }
 0x1fd   : > { %v2497_v56 = vsel %vm250_vm0, %v2493_v63, 0.0  ;;  %v2614_v9 = vmul.f32 %v3666_v5, %v4487_v14  ;;  %v3668_v4 = vpop.eup %3667 }
 0x1fe   : > { %2628 = vadd.xlane.f32.xlu1 %v2627_v37  ;;  %v2503_v8 = vsel %vm250_vm0, %v2495_v46, 0.0  ;;  %v2616_v11 = vmul.f32 %v3668_v4, %v4487_v14  ;;  %v3670_v6 = vpop.eup %3669 }
 0x1ff   : > { %2063 = vadd.xlane.f32.xlu0 %v2062_v16  ;;  %v2618_v62 = vsel %vm250_vm0, %v2614_v9, 0.0  ;;  %v2735_v17 = vmul.f32 %v3670_v6, %v4487_v14  ;;  %v3672_v18 = vpop.eup %3671 }
 0x200   : > { %v2624_v15 = vsel %vm250_vm0, %v2616_v11, 0.0  ;;  %v2737_v21 = vmul.f32 %v3672_v18, %v4487_v14 }
 0x201   : > { %v2739_v20 = vsel %vm250_vm0, %v2735_v17, 0.0 }
 0x202   : > { %2743 = vadd.xlane.f32.xlu1 %v2742_v45  ;;  %v2745_v23 = vsel %vm250_vm0, %v2737_v21, 0.0 }
 0x203   : > { %2069 = vadd.xlane.f32.xlu0 %v2068_v48 }
 0x206   : > { %2749 = vadd.xlane.f32.xlu1 %v2748_v51 }
 0x207   : > { %2377 = vadd.xlane.f32.xlu0 %v2376_v52 }
 0x20b   : > { %2383 = vadd.xlane.f32.xlu0 %v2382_v57 }
 0x20f   : > { %2386 = vadd.xlane.f32.xlu0 %v2385_v61 }
 0x213   : > { %2498 = vadd.xlane.f32.xlu0 %v2497_v56 }
 0x217   : > { %2504 = vadd.xlane.f32.xlu0 %v2503_v8 }
 0x21b   : > { %2619 = vadd.xlane.f32.xlu0 %v2618_v62 }
 0x21c   : > { %v488_v26 = vpop.xlane.xlu1 %487 }
 0x21d   : > { %v738_v28 = vmax.f32 %v367_v10, %v488_v26 }
 0x21e   : > { %v485_v3 = vpop.xlane.xlu0 %484 }
 0x21f   : > { %2625 = vadd.xlane.f32.xlu0 %v2624_v15  ;;  %v737_v41 = vmax.f32 %v364_v1, %v485_v3 }
 0x223   : > { %2740 = vadd.xlane.f32.xlu0 %v2739_v20 }
 0x226   : > { %v609_v12 = vpop.xlane.xlu1 %608 }
 0x227   : > { %2746 = vadd.xlane.f32.xlu0 %v2745_v23  ;;  %v742_v19 = vmax.f32 %v738_v28, %v609_v12 }
 0x228   : > { %v606_v24 = vpop.xlane.xlu0 %605 }
 0x229   : > { %v741_v16 = vmax.f32 %v737_v41, %v606_v24 }
 0x22c   : > { %v494_v27 = vpop.xlane.xlu0 %493 }
 0x22d   : > { %v740_v50 = vmax.f32 %v4717_v7, %v494_v27 }
 0x230   : > { %v615_v29 = vpop.xlane.xlu0 %614 }
 0x231   : > { %v744_v55 = vmax.f32 %v740_v50, %v615_v29 }
 0x232   : > { %v730_v30 = vpop.xlane.xlu1 %729 }
 0x233   : > { %v746_v31 = vmax.f32 %v742_v19, %v730_v30 }
 0x234   : > { %v4726_v32 = vpop.xlane.xlu0 %490 }
 0x235   : > { %v750_v33 = vsub.f32 %v367_v10, %v746_v31  ;;  %v762_v14 = vsub.f32 %v488_v26, %v746_v31  ;;  %v774_v34 = vsub.f32 %v609_v12, %v746_v31  ;;  %v786_v13 = vsub.f32 %v730_v30, %v746_v31 }
 0x236   : > { %v4730_v44 = vpop.xlane.xlu1 %1026  ;;  %v739_v9 = vmax.f32 %v4723_v22, %v4726_v32 }
 0x237   : > { %v755_v35 = vmul.f32 1.442695, %v750_v33  ;;  %v767_v36 = vmul.f32 1.442695, %v762_v14  ;;  %v779_v37 = vmul.f32 1.442695, %v774_v34 }
 0x238   : > { %v4728_v40 = vpop.xlane.xlu0 %611  ;;  %v791_v42 = vmul.f32 1.442695, %v786_v13 }
 0x239   : > { %3673 = vpow2.f32 %v755_v35 }
 0x23a   : > { %3675 = vpow2.f32 %v767_v36 }
 0x23b   : > { %3677 = vpow2.f32 %v779_v37 }
 0x23c   : > { %v727_v43 = vpop.xlane.xlu0 %726  ;;  %3679 = vpow2.f32 %v791_v42 }
 0x23d   : > { %v745_v45 = vmax.f32 %v741_v16, %v727_v43 }
 0x23f   : > { %v749_v25 = vsub.f32 %v364_v1, %v745_v45  ;;  %v761_v47 = vsub.f32 %v485_v3, %v745_v45  ;;  %v773_v48 = vsub.f32 %v606_v24, %v745_v45  ;;  %v785_v39 = vsub.f32 %v727_v43, %v745_v45  ;;  %v4735_v38 = vpop.xlane.xlu1 %1147 }
 0x240   : > { %v4732_v49 = vpop.xlane.xlu0 %1023 }
 0x241   : > { %v753_v51 = vmul.f32 1.442695, %v749_v25  ;;  %v765_v52 = vmul.f32 1.442695, %v761_v47  ;;  %v777_v54 = vmul.f32 1.442695, %v773_v48 }
 0x242   : > { %v789_v53 = vmul.f32 1.442695, %v785_v39 }
 0x243   : > { %3681 = vpow2.f32 %v753_v51 }
 0x244   : > { %3683 = vpow2.f32 %v765_v52  ;;  %v736_v57 = vpop.xlane.xlu0 %735 }
 0x245   : > { %v748_v58 = vmax.f32 %v744_v55, %v736_v57  ;;  %3685 = vpow2.f32 %v777_v54 }
 0x246   : > { %v4737_v59 = vpop.eup %3673  ;;  %3687 = vpow2.f32 %v789_v53 }
 0x247   : > { %v4739_v60 = vpop.eup %3675  ;;  %v752_v61 = vsub.f32 %v4717_v7, %v748_v58  ;;  %v764_v0 = vsub.f32 %v494_v27, %v748_v58  ;;  %v776_v63 = vsub.f32 %v615_v29, %v748_v58  ;;  %v1269_v2 = vpop.xlane.xlu1 %1268  ;;  %v788_v46 = vsub.f32 %v736_v57, %v748_v58 }
 0x248   : > { %v798_v56 = vadd.f32 %v4739_v60, %v4737_v59  ;;  %v4744_v5 = vpop.xlane.xlu0 %1032  ;;  %v4746_v8 = vpop.eup %3677  ;;  %v743_v7 = vmax.f32 %v739_v9, %v4728_v40  ;;  %v1398_v27 = vmax.f32 %v4730_v44, %v4735_v38 }
 0x249   : > { %v759_v4 = vmul.f32 1.442695, %v752_v61  ;;  %v771_v10 = vmul.f32 1.442695, %v764_v0  ;;  %v783_v62 = vmul.f32 1.442695, %v776_v63  ;;  %v4751_v6 = vpop.eup %3679 }
 0x24a   : > { %v802_v11 = vadd.f32 %v4746_v8, %v798_v56  ;;  %v795_v17 = vmul.f32 1.442695, %v788_v46  ;;  %v1402_v31 = vmax.f32 %v1398_v27, %v1269_v2 }
 0x24b   : > { %3689 = vpow2.f32 %v759_v4  ;;  %v4754_v1 = vpop.xlane.xlu1 %1153 }
 0x24c   : > { %v806_v15 = vadd.f32 %v4751_v6, %v802_v11  ;;  %3691 = vpow2.f32 %v771_v10  ;;  %v733_v18 = vpop.xlane.xlu0 %732  ;;  %v1400_v47 = vmax.f32 %v4744_v5, %v4754_v1 }
 0x24d   : > { %3693 = vpow2.f32 %v783_v62  ;;  %v747_v20 = vmax.f32 %v743_v7, %v733_v18  ;;  %v4808_v62 = vld [vmem:[%s4129_s8 + $0x20] sm:$0xff] }
 0x24e   : > { %3695 = vrcp.f32 %v806_v15 }
 0x24f   : > { %v751_v21 = vsub.f32 %v4723_v22, %v747_v20  ;;  %v763_v3 = vsub.f32 %v4726_v32, %v747_v20  ;;  %v775_v23 = vsub.f32 %v4728_v40, %v747_v20  ;;  %v4760_v24 = vpop.xlane.xlu1 %1274  ;;  %3697 = vpow2.f32 %v795_v17 }
 0x250   : > { %v4762_v26 = vpop.eup %3681  ;;  %v787_v12 = vsub.f32 %v733_v18, %v747_v20  ;;  %v4766_v28 = vpop.xlane.xlu0 %1029  ;;  %v1404_v55 = vmax.f32 %v1400_v47, %v4760_v24 }
 0x251   : > { %v4768_v29 = vpop.eup %3683  ;;  %v757_v19 = vmul.f32 1.442695, %v751_v21  ;;  %v769_v30 = vmul.f32 1.442695, %v763_v3  ;;  %v781_v32 = vmul.f32 1.442695, %v775_v23 }
 0x252   : > { %v797_v22 = vadd.f32 %v4768_v29, %v4762_v26  ;;  %v4772_v33 = vpop.eup %3685  ;;  %v793_v14 = vmul.f32 1.442695, %v787_v12 }
 0x253   : > { %3699 = vpow2.f32 %v757_v19  ;;  %v1390_v34 = vpop.xlane.xlu1 %1389  ;;  %v4777_v37 = vpop.eup %3687 }
 0x254   : > { %v801_v13 = vadd.f32 %v4772_v33, %v797_v22  ;;  %3701 = vpow2.f32 %v769_v30  ;;  %v1406_v35 = vmax.f32 %v1402_v31, %v1390_v34  ;;  %v4775_v36 = vpop.xlane.xlu0 %1144 }
 0x255   : > { %3703 = vpow2.f32 %v781_v32  ;;  %v1397_v20 = vmax.f32 %v4732_v49, %v4775_v36 }
 0x256   : > { %v805_v40 = vadd.f32 %v4777_v37, %v801_v13  ;;  %v1410_v41 = vsub.f32 %v4730_v44, %v1406_v35  ;;  %v1422_v42 = vsub.f32 %v4735_v38, %v1406_v35  ;;  %3705 = vpow2.f32 %v793_v14 }
 0x257   : > { %v1434_v16 = vsub.f32 %v1269_v2, %v1406_v35  ;;  %v1446_v43 = vsub.f32 %v1390_v34, %v1406_v35  ;;  %v4782_v45 = vpop.xlane.xlu1 %1703 }
 0x258   : > { %v4784_v25 = vpop.eup %3689  ;;  %3707 = vrcp.f32 %v805_v40  ;;  %v1415_v48 = vmul.f32 1.442695, %v1410_v41  ;;  %v1427_v39 = vmul.f32 1.442695, %v1422_v42  ;;  %v4788_v50 = vpop.xlane.xlu0 %1265 }
 0x259   : > { %v4790_v51 = vpop.eup %3691  ;;  %v1439_v44 = vmul.f32 1.442695, %v1434_v16  ;;  %v1451_v53 = vmul.f32 1.442695, %v1446_v43  ;;  %v1401_v27 = vmax.f32 %v1397_v20, %v4788_v50 }
 0x25a   : > { %v4792_v52 = vpop.eup %3693  ;;  %v800_v54 = vadd.f32 %v4790_v51, %v4784_v25  ;;  %3709 = vpow2.f32 %v1415_v48 }
 0x25b   : > { %v3696_v38 = vpop.eup %3695  ;;  %3711 = vpow2.f32 %v1427_v39  ;;  %v1396_v57 = vpop.xlane.xlu1 %1395  ;;  %v4854_v39 = vld [vmem:[%s4129_s8] sm:$0xff] }
 0x25c   : > { %v804_v58 = vadd.f32 %v4792_v52, %v800_v54  ;;  %v1408_v61 = vmax.f32 %v1404_v55, %v1396_v57  ;;  %v4798_v0 = vpop.xlane.xlu0 %1150  ;;  %v826_v63 = vmul.f32 %v3696_v38, %v4739_v60  ;;  %v4801_v2 = vpop.eup %3697  ;;  %3713 = vpow2.f32 %v1439_v44 }
 0x25d   : > { %3715 = vpow2.f32 %v1451_v53  ;;  %v854_v60 = vmul.f32 %v3696_v38, %v4746_v8  ;;  %v4824_v3 = vmul.f32 %v3696_v38, %v4737_v59  ;;  %v882_v23 = vmul.f32 %v3696_v38, %v4751_v6 }
 0x25e   : > { %v808_v56 = vadd.f32 %v4801_v2, %v804_v58  ;;  %v1412_v46 = vsub.f32 %v4744_v5, %v1408_v61  ;;  %v1424_v9 = vsub.f32 %v4754_v1, %v1408_v61  ;;  %v1436_v4 = vsub.f32 %v4760_v24, %v1408_v61 }
 0x25f   : > { %v1448_v10 = vsub.f32 %v1396_v57, %v1408_v61  ;;  %v830_v11 = vmul.f32 %v4808_v62, %v826_v63  ;;  %v4811_v7 = vpop.xlane.xlu1 %1824  ;;  %v858_v19 = vmul.f32 %v4808_v62, %v854_v60  ;;  %v886_v34 = vmul.f32 %v4808_v62, %v882_v23 }
 0x260   : > { %v4814_v15 = vpop.eup %3699  ;;  %3717 = vrcp.f32 %v808_v56  ;;  %v1419_v17 = vmul.f32 1.442695, %v1412_v46  ;;  %v1431_v18 = vmul.f32 1.442695, %v1424_v9  ;;  %v4816_v5 = vpop.xlane.xlu0 %1271  ;;  %v1443_v21 = vmul.f32 1.442695, %v1436_v4 }
 0x261   : > { %v4818_v1 = vpop.eup %3701  ;;  %839 = vrot.lane.b32.xlu1 %v830_v11, %s3979_s23  ;;  %v1455_v12 = vmul.f32 1.442695, %v1448_v10  ;;  %v2075_v55 = vmax.f32 %v4782_v45, %v4811_v7 }
 0x262   : > { %v799_v8 = vadd.f32 %v4818_v1, %v4814_v15  ;;  %3719 = vpow2.f32 %v1419_v17  ;;  %v4829_v24 = vpop.eup %3703 }
 0x263   : > { %3721 = vpow2.f32 %v1431_v18  ;;  %v4833_v30 = vpop.xlane.xlu1 %1945  ;;  %v4835_v22 = vpop.eup %3705 }
 0x264   : > { %v803_v59 = vadd.f32 %v4829_v24, %v799_v8  ;;  %v1387_v31 = vpop.xlane.xlu0 %1386  ;;  %3723 = vpow2.f32 %v1443_v21  ;;  %v2079_v10 = vmax.f32 %v2075_v55, %v4833_v30 }
 0x265   : > { %v3708_v32 = vpop.eup %3707  ;;  %867 = vrot.lane.b32.xlu1 %v858_v19, %s3980_s21  ;;  %v1405_v6 = vmax.f32 %v1401_v27, %v1387_v31  ;;  %3725 = vpow2.f32 %v1455_v12 }
 0x266   : > { %v807_v14 = vadd.f32 %v4835_v22, %v803_v59  ;;  %v825_v13 = vmul.f32 %v3708_v32, %v4768_v29  ;;  %v853_v44 = vmul.f32 %v3708_v32, %v4772_v33  ;;  %v4867_v53 = vmul.f32 %v3708_v32, %v4762_v26 }
 0x267   : > { %v4842_v35 = vpop.eup %3709  ;;  %v1409_v40 = vsub.f32 %v4732_v49, %v1405_v6  ;;  %v1421_v41 = vsub.f32 %v4775_v36, %v1405_v6  ;;  %v1433_v42 = vsub.f32 %v4788_v50, %v1405_v6  ;;  %v4847_v16 = vpop.xlane.xlu1 %1830  ;;  %v1445_v47 = vsub.f32 %v1387_v31, %v1405_v6 }
 0x268   : > { %v4849_v43 = vpop.eup %3711  ;;  %3727 = vrcp.f32 %v807_v14  ;;  %v4851_v48 = vpop.xlane.xlu0 %1700  ;;  %v829_v29 = vmul.f32 %v4854_v39, %v825_v13  ;;  %v881_v58 = vmul.f32 %v3708_v32, %v4777_v37  ;;  %v857_v46 = vmul.f32 %v4854_v39, %v853_v44 }
 0x269   : > { %v1458_v49 = vadd.f32 %v4849_v43, %v4842_v35  ;;  %v1413_v36 = vmul.f32 1.442695, %v1409_v40  ;;  %v1425_v54 = vmul.f32 1.442695, %v1421_v41  ;;  %895 = vrot.lane.b32.xlu1 %v886_v34, %s3981_s24  ;;  %v4861_v50 = vpop.eup %3713  ;;  %v1437_v38 = vmul.f32 1.442695, %v1433_v42 }
 0x26a   : > { %837 = vrot.lane.b32.xlu0 %v829_v29, %s3979_s23  ;;  %v4873_v61 = vpop.eup %3715  ;;  %v1449_v63 = vmul.f32 1.442695, %v1445_v47  ;;  %v1399_v26 = vmax.f32 %v4766_v28, %v4798_v0  ;;  %v885_v18 = vmul.f32 %v4854_v39, %v881_v58 }
 0x26b   : > { %v1462_v33 = vadd.f32 %v4861_v50, %v1458_v49  ;;  %3729 = vpow2.f32 %v1413_v36  ;;  %v4870_v57 = vpop.xlane.xlu1 %1951 }
 0x26c   : > { %3731 = vpow2.f32 %v1425_v54  ;;  %v4875_v56 = vpop.xlane.xlu0 %1709  ;;  %v1403_v60 = vmax.f32 %v1399_v26, %v4816_v5 }
 0x26d   : > { %v3718_v9 = vpop.eup %3717  ;;  %v1466_v4 = vadd.f32 %v4873_v61, %v1462_v33  ;;  %3733 = vpow2.f32 %v1437_v38  ;;  %v2077_v8 = vmax.f32 %v4875_v56, %v4847_v16 }
 0x26e   : > { %865 = vrot.lane.b32.xlu0 %v857_v46, %s3980_s21  ;;  %v828_v37 = vmul.f32 %v3718_v9, %v4790_v51  ;;  %v4889_v20 = vmul.f32 %v3718_v9, %v4784_v25  ;;  %v4898_v51 = vld [vmem:[%s4129_s8 + $0x60] sm:$0xff]  ;;  %v856_v25 = vmul.f32 %v3718_v9, %v4792_v52  ;;  %v884_v31 = vmul.f32 %v3718_v9, %v4801_v2 }
 0x26f   : > { %v4884_v11 = vpop.eup %3719  ;;  %3735 = vrcp.f32 %v1466_v4  ;;  %v2067_v17 = vpop.xlane.xlu1 %2066 }
 0x270   : > { %v4891_v21 = vpop.eup %3721  ;;  %3737 = vpow2.f32 %v1449_v63  ;;  %v2083_v23 = vmax.f32 %v2079_v10, %v2067_v17  ;;  %v4895_v27 = vpop.xlane.xlu0 %1392  ;;  %v832_v12 = vmul.f32 %v4898_v51, %v828_v37  ;;  %v888_v36 = vmul.f32 %v4898_v51, %v884_v31 }
 0x271   : > { %v1460_v19 = vadd.f32 %v4891_v21, %v4884_v11  ;;  %v1407_v59 = vmax.f32 %v1403_v60, %v4895_v27  ;;  %v4906_v32 = vpop.eup %3723  ;;  %v4943_v60 = vld [vmem:[%s4129_s8 + $0x40] sm:$0xff] }
 0x272   : > { %v2087_v6 = vsub.f32 %v4782_v45, %v2083_v23  ;;  %v2099_v14 = vsub.f32 %v4811_v7, %v2083_v23  ;;  %v2111_v34 = vsub.f32 %v4833_v30, %v2083_v23  ;;  %v2123_v13 = vsub.f32 %v2067_v17, %v2083_v23  ;;  %893 = vrot.lane.b32.xlu0 %v885_v18, %s3981_s24  ;;  %v4917_v2 = vpop.eup %3725 }
 0x273   : > { %v1464_v40 = vadd.f32 %v4906_v32, %v1460_v19  ;;  %v1411_v41 = vsub.f32 %v4766_v28, %v1407_v59  ;;  %843 = vrot.lane.b32.xlu1 %v832_v12, %s3979_s23  ;;  %v4915_v52 = vpop.xlane.xlu1 %2072  ;;  %v1423_v45 = vsub.f32 %v4798_v0, %v1407_v59  ;;  %v2081_v7 = vmax.f32 %v2077_v8, %v4870_v57 }
 0x274   : > { %v2092_v42 = vmul.f32 1.442695, %v2087_v6  ;;  %v2104_v47 = vmul.f32 1.442695, %v2099_v14  ;;  %v4921_v30 = vpop.xlane.xlu0 %1706  ;;  %v2116_v49 = vmul.f32 1.442695, %v2111_v34  ;;  %v860_v28 = vmul.f32 %v4898_v51, %v856_v25 }
 0x275   : > { %v3728_v29 = vpop.eup %3727  ;;  %v1468_v44 = vadd.f32 %v4917_v2, %v1464_v40  ;;  %v2128_v54 = vmul.f32 1.442695, %v2123_v13  ;;  %v1435_v55 = vsub.f32 %v4816_v5, %v1407_v59  ;;  %v2085_v38 = vmax.f32 %v2081_v7, %v4915_v52 }
 0x276   : > { %3739 = vpow2.f32 %v2092_v42  ;;  %v1417_v0 = vmul.f32 1.442695, %v1411_v41  ;;  %v1447_v33 = vsub.f32 %v4895_v27, %v1407_v59  ;;  %v855_v63 = vmul.f32 %v3728_v29, %v4829_v24 }
 0x277   : > { %3741 = vrcp.f32 %v1468_v44  ;;  %871 = vrot.lane.b32.xlu1 %v860_v28, %s3980_s21  ;;  %v4930_v58 = vpop.xlane.xlu1 %2380  ;;  %v1429_v9 = vmul.f32 1.442695, %v1423_v45  ;;  %v2089_v4 = vsub.f32 %v4875_v56, %v2085_v38  ;;  %v883_v26 = vmul.f32 %v3728_v29, %v4835_v22 }
 0x278   : > { %v4933_v46 = vpop.eup %3729  ;;  %3743 = vpow2.f32 %v2104_v47  ;;  %v4936_v5 = vpop.xlane.xlu0 %1821  ;;  %v2101_v37 = vsub.f32 %v4847_v16, %v2085_v38  ;;  %v859_v17 = vmul.f32 %v4943_v60, %v855_v63  ;;  %v827_v24 = vmul.f32 %v3728_v29, %v4818_v1 }
 0x279   : > { %v4939_v10 = vpop.eup %3731  ;;  %3745 = vpow2.f32 %v2116_v49  ;;  %v1441_v56 = vmul.f32 1.442695, %v1435_v55  ;;  %v2096_v22 = vmul.f32 1.442695, %v2089_v4  ;;  %v2113_v23 = vsub.f32 %v4870_v57, %v2085_v38 }
 0x27a   : > { %v1457_v18 = vadd.f32 %v4939_v10, %v4933_v46  ;;  %3747 = vpow2.f32 %v2128_v54  ;;  %v4949_v8 = vpop.eup %3733  ;;  %869 = vrot.lane.b32.xlu0 %v859_v17, %s3980_s21  ;;  %v1453_v12 = vmul.f32 1.442695, %v1447_v33  ;;  %v2125_v19 = vsub.f32 %v4915_v52, %v2085_v38  ;;  %v4974_v52 = vld [vmem:[%s4129_s8 + $0x28] sm:$0xff] }
 0x27b   : > { %3749 = vpow2.f32 %v1417_v0  ;;  %899 = vrot.lane.b32.xlu1 %v888_v36, %s3981_s24  ;;  %v4954_v16 = vpop.xlane.xlu1 %2501  ;;  %v2108_v31 = vmul.f32 1.442695, %v2101_v37  ;;  %v887_v57 = vmul.f32 %v4943_v60, %v883_v26  ;;  %v831_v6 = vmul.f32 %v4943_v60, %v827_v24 }
 0x27c   : > { %v3736_v27 = vpop.eup %3735  ;;  %v1461_v1 = vadd.f32 %v4949_v8, %v1457_v18  ;;  %3751 = vpow2.f32 %v1429_v9  ;;  %v4958_v59 = vpop.xlane.xlu0 %1942  ;;  %v4967_v13 = vmul.f32 %v3728_v29, %v4814_v15  ;;  %v2120_v40 = vmul.f32 1.442695, %v2113_v23 }
 0x27d   : > { %v4960_v25 = vpop.eup %3737  ;;  %v1486_v14 = vmul.f32 %v3736_v27, %v4849_v43  ;;  %3753 = vpow2.f32 %v1441_v56  ;;  %v4978_v43 = vmul.f32 %v3736_v27, %v4842_v35  ;;  %v2132_v15 = vmul.f32 1.442695, %v2125_v19 }
 0x27e   : > { %v1465_v34 = vadd.f32 %v4960_v25, %v1461_v1  ;;  %3755 = vpow2.f32 %v2096_v22  ;;  %897 = vrot.lane.b32.xlu0 %v887_v57, %s3981_s24  ;;  %v1514_v45 = vmul.f32 %v3736_v27, %v4861_v50  ;;  %v2752_v35 = vmax.f32 %v4930_v58, %v4954_v16 }
 0x27f   : > { %841 = vrot.lane.b32.xlu1 %v831_v6, %s3979_s23  ;;  %v4971_v41 = vpop.xlane.xlu1 %2507  ;;  %v1490_v42 = vmul.f32 %v4974_v52, %v1486_v14  ;;  %3757 = vpow2.f32 %v1453_v12  ;;  %v2074_v50 = vmax.f32 %v4851_v48, %v4936_v5  ;;  %v1542_v54 = vmul.f32 %v3736_v27, %v4873_v61 }
 0x280   : > { %v4980_v47 = vpop.xlane.xlu0 %1827  ;;  %3759 = vpow2.f32 %v2108_v31  ;;  %v1518_v36 = vmul.f32 %v4974_v52, %v1514_v45  ;;  %v5041_v45 = vld [vmem:[%s4129_s8 + $0x68] sm:$0xff] }
 0x281   : > { %3761 = vrcp.f32 %v1465_v34  ;;  %v2078_v63 = vmax.f32 %v2074_v50, %v4958_v59  ;;  %v2076_v26 = vmax.f32 %v4921_v30, %v4980_v47  ;;  %v1546_v18 = vmul.f32 %v4974_v52, %v1542_v54 }
 0x282   : > { %3763 = vpow2.f32 %v2120_v40 }
 0x283   : > { %v4983_v7 = vpop.eup %3739  ;;  %1499 = vrot.lane.b32.xlu1 %v1490_v42, %s3979_s23  ;;  %v4986_v29 = vpop.xlane.xlu1 %2622  ;;  %3765 = vpow2.f32 %v2132_v15 }
 0x284   : > { %v3742_v44 = vpop.eup %3741  ;;  %v4990_v49 = vpop.xlane.xlu0 %1948  ;;  %v2756_v37 = vmax.f32 %v2752_v35, %v4986_v29 }
 0x285   : > { %v4992_v28 = vpop.eup %3743  ;;  %v5003_v0 = vmul.f32 %v3742_v44, %v4884_v11  ;;  %v1488_v56 = vmul.f32 %v3742_v44, %v4891_v21  ;;  %v2080_v27 = vmax.f32 %v2076_v26, %v4990_v49  ;;  %v1516_v42 = vmul.f32 %v3742_v44, %v4906_v32 }
 0x286   : > { %v4998_v55 = vpop.eup %3745  ;;  %v2135_v38 = vadd.f32 %v4992_v28, %v4983_v7 }
 0x287   : > { %v5005_v33 = vpop.eup %3747  ;;  %1527 = vrot.lane.b32.xlu1 %v1518_v36, %s3980_s21  ;;  %v5009_v9 = vpop.xlane.xlu1 %2628  ;;  %v1492_v35 = vmul.f32 %v5041_v45, %v1488_v56 }
 0x288   : > { %v5011_v4 = vpop.eup %3749  ;;  %v2139_v61 = vadd.f32 %v4998_v55, %v2135_v38  ;;  %v2064_v17 = vpop.xlane.xlu0 %2063 }
 0x289   : > { %v5017_v11 = vpop.eup %3751  ;;  %v2082_v24 = vmax.f32 %v2078_v63, %v2064_v17 }
 0x28a   : > { %v2143_v22 = vadd.f32 %v5005_v33, %v2139_v61  ;;  %v1459_v23 = vadd.f32 %v5017_v11, %v5011_v4  ;;  %v5025_v1 = vpop.eup %3753 }
 0x28b   : > { %v2086_v12 = vsub.f32 %v4851_v48, %v2082_v24  ;;  %v2098_v19 = vsub.f32 %v4936_v5, %v2082_v24  ;;  %v2110_v31 = vsub.f32 %v4958_v59, %v2082_v24  ;;  %v2122_v57 = vsub.f32 %v2064_v17, %v2082_v24  ;;  %1555 = vrot.lane.b32.xlu1 %v1546_v18, %s3981_s24  ;;  %v2744_v21 = vpop.xlane.xlu1 %2743  ;;  %v5031_v6 = vpop.eup %3755 }
 0x28c   : > { %3767 = vrcp.f32 %v2143_v22  ;;  %v1463_v14 = vadd.f32 %v5025_v1, %v1459_v23  ;;  %v2760_v34 = vmax.f32 %v2756_v37, %v2744_v21  ;;  %v5034_v40 = vpop.xlane.xlu0 %2069  ;;  %v5037_v48 = vpop.eup %3757  ;;  %v1520_v23 = vmul.f32 %v5041_v45, %v1516_v42 }
 0x28d   : > { %v2090_v15 = vmul.f32 1.442695, %v2086_v12  ;;  %v2102_v5 = vmul.f32 1.442695, %v2098_v19  ;;  %v2084_v59 = vmax.f32 %v2080_v27, %v5034_v40  ;;  %v5044_v50 = vpop.eup %3759  ;;  %v2114_v54 = vmul.f32 1.442695, %v2110_v31 }
 0x28e   : > { %v1467_v36 = vadd.f32 %v5037_v48, %v1463_v14  ;;  %v2764_v38 = vsub.f32 %v4930_v58, %v2760_v34  ;;  %v2776_v63 = vsub.f32 %v4954_v16, %v2760_v34  ;;  %v3762_v32 = vpop.eup %3761  ;;  %v2137_v61 = vadd.f32 %v5044_v50, %v5031_v6 }
 0x28f   : > { %3769 = vpow2.f32 %v2090_v15  ;;  %v2126_v26 = vmul.f32 1.442695, %v2122_v57  ;;  %v2788_v37 = vsub.f32 %v4986_v29, %v2760_v34  ;;  %1503 = vrot.lane.b32.xlu1 %v1492_v35, %s3979_s23  ;;  %v5053_v17 = vpop.eup %3763  ;;  %v2800_v18 = vsub.f32 %v2744_v21, %v2760_v34  ;;  %v5072_v34 = vld [vmem:[%s4129_s8 + $0x8] sm:$0xff] }
 0x290   : > { %3771 = vrcp.f32 %v1467_v36  ;;  %v2769_v24 = vmul.f32 1.442695, %v2764_v38  ;;  %v5055_v56 = vpop.xlane.xlu0 %2377  ;;  %v1544_v58 = vmul.f32 %v3742_v44, %v4917_v2  ;;  %v2141_v16 = vadd.f32 %v5053_v17, %v2137_v61  ;;  %v5061_v27 = vpop.eup %3765 }
 0x291   : > { %3773 = vpow2.f32 %v2102_v5  ;;  %v2088_v22 = vsub.f32 %v4921_v30, %v2084_v59  ;;  %v2781_v29 = vmul.f32 1.442695, %v2776_v63  ;;  %v2100_v12 = vsub.f32 %v4980_v47, %v2084_v59 }
 0x292   : > { %3775 = vpow2.f32 %v2114_v54  ;;  %v2145_v19 = vadd.f32 %v5061_v27, %v2141_v16  ;;  %v2793_v31 = vmul.f32 1.442695, %v2788_v37  ;;  %v1485_v2 = vmul.f32 %v3762_v32, %v4939_v10 }
 0x293   : > { %3777 = vpow2.f32 %v2126_v26  ;;  %1531 = vrot.lane.b32.xlu1 %v1520_v23, %s3980_s21  ;;  %v2805_v44 = vmul.f32 1.442695, %v2800_v18  ;;  %v2112_v30 = vsub.f32 %v4990_v49, %v2084_v59  ;;  %v1548_v21 = vmul.f32 %v5041_v45, %v1544_v58 }
 0x294   : > { %3779 = vpow2.f32 %v2769_v24  ;;  %v5068_v57 = vpop.xlane.xlu0 %2383  ;;  %v2094_v14 = vmul.f32 1.442695, %v2088_v22  ;;  %v1489_v47 = vmul.f32 %v5072_v34, %v1485_v2  ;;  %v1513_v42 = vmul.f32 %v3762_v32, %v4949_v8 }
 0x295   : > { %3781 = vrcp.f32 %v2145_v19  ;;  %v2106_v15 = vmul.f32 1.442695, %v2100_v12  ;;  %v2124_v10 = vsub.f32 %v5034_v40, %v2084_v59  ;;  %v5078_v5 = vmul.f32 %v3762_v32, %v4933_v46  ;;  %v2750_v59 = vpop.xlane.xlu1 %2749 }
 0x296   : > { %3783 = vpow2.f32 %v2781_v29  ;;  %1497 = vrot.lane.b32.xlu0 %v1489_v47, %s3979_s23  ;;  %v2118_v49 = vmul.f32 1.442695, %v2112_v30  ;;  %v1517_v8 = vmul.f32 %v5072_v34, %v1513_v42  ;;  %v1541_v40 = vmul.f32 %v3762_v32, %v4960_v25 }
 0x297   : > { %3785 = vpow2.f32 %v2793_v31  ;;  %1559 = vrot.lane.b32.xlu1 %v1548_v21, %s3981_s24  ;;  %v2130_v46 = vmul.f32 1.442695, %v2124_v10  ;;  %v5117_v31 = vld [vmem:[%s4129_s8 + $0x48] sm:$0xff]  ;;  %v5135_v10 = vld [vmem:[%s4129_s8 + $0x30] sm:$0xff] }
 0x298   : > { %3787 = vpow2.f32 %v2805_v44  ;;  %v2387_v35 = vpop.xlane.xlu0 %2386  ;;  %v1545_v24 = vmul.f32 %v5072_v34, %v1541_v40 }
 0x299   : > { %v5082_v36 = vpop.eup %3767  ;;  %3789 = vpow2.f32 %v2094_v14  ;;  %v2754_v54 = vmax.f32 %v2387_v35, %v4971_v41 }
 0x29a   : > { %3791 = vpow2.f32 %v2106_v15  ;;  %1525 = vrot.lane.b32.xlu0 %v1517_v8, %s3980_s21  ;;  %v5091_v63 = vmul.f32 %v5082_v36, %v4983_v7  ;;  %v2163_v32 = vmul.f32 %v5082_v36, %v4992_v28 }
 0x29b   : > { %v2758_v38 = vmax.f32 %v2754_v54, %v5009_v9  ;;  %3793 = vpow2.f32 %v2118_v49 }
 0x29c   : > { %v5093_v61 = vpop.eup %3769  ;;  %v5095_v26 = vpop.xlane.xlu0 %2498  ;;  %3795 = vpow2.f32 %v2130_v46  ;;  %v2167_v49 = vmul.f32 %v5135_v10, %v2163_v32 }
 0x29d   : > { %v3772_v37 = vpop.eup %3771  ;;  %v2762_v25 = vmax.f32 %v2758_v38, %v2750_v59 }
 0x29e   : > { %v5100_v18 = vpop.eup %3773  ;;  %v1515_v58 = vmul.f32 %v3772_v37, %v5025_v1  ;;  %v1487_v7 = vmul.f32 %v3772_v37, %v5017_v11  ;;  %v5105_v16 = vmul.f32 %v3772_v37, %v5011_v4  ;;  %1553 = vrot.lane.b32.xlu0 %v1545_v24, %s3981_s24 }
 0x29f   : > { %v5107_v22 = vpop.eup %3775  ;;  %v2134_v23 = vadd.f32 %v5100_v18, %v5093_v61  ;;  %v2766_v29 = vsub.f32 %v2387_v35, %v2762_v25  ;;  %v2778_v28 = vsub.f32 %v4971_v41, %v2762_v25  ;;  %v2790_v12 = vsub.f32 %v5009_v9, %v2762_v25 }
 0x2a0   : > { %v5114_v19 = vpop.eup %3777  ;;  %v2802_v1 = vsub.f32 %v2750_v59, %v2762_v25  ;;  %v1519_v4 = vmul.f32 %v5117_v31, %v1515_v58  ;;  %v1491_v11 = vmul.f32 %v5117_v31, %v1487_v7  ;;  %v5121_v2 = vpop.xlane.xlu0 %2504  ;;  %v1543_v9 = vmul.f32 %v3772_v37, %v5037_v48 }
 0x2a1   : > { %v5123_v44 = vpop.eup %3779  ;;  %v2138_v30 = vadd.f32 %v5107_v22, %v2134_v23  ;;  %v2773_v21 = vmul.f32 1.442695, %v2766_v29  ;;  %v2785_v41 = vmul.f32 1.442695, %v2778_v28  ;;  %v2797_v47 = vmul.f32 1.442695, %v2790_v12 }
 0x2a2   : > { %v5127_v14 = vpop.eup %3781  ;;  %1501 = vrot.lane.b32.xlu1 %v1491_v11, %s3979_s23  ;;  %1529 = vrot.lane.b32.xlu0 %v1519_v4, %s3980_s21  ;;  %v2191_v35 = vmul.f32 %v5082_v36, %v4998_v55  ;;  %v2809_v54 = vmul.f32 1.442695, %v2802_v1  ;;  %v1547_v38 = vmul.f32 %v5117_v31, %v1543_v9  ;;  %v2751_v29 = vmax.f32 %v5055_v56, %v5095_v26 }
 0x2a3   : > { %v5130_v42 = vpop.eup %3783  ;;  %v2142_v15 = vadd.f32 %v5114_v19, %v2138_v30  ;;  %3797 = vpow2.f32 %v2773_v21  ;;  %v5146_v46 = vmul.f32 %v5127_v14, %v5031_v6  ;;  %v2219_v6 = vmul.f32 %v5082_v36, %v5005_v33 }
 0x2a4   : > { %v5140_v48 = vpop.eup %3785  ;;  %v2812_v8 = vadd.f32 %v5130_v42, %v5123_v44  ;;  %3799 = vpow2.f32 %v2785_v41  ;;  %v2620_v40 = vpop.xlane.xlu0 %2619  ;;  %v2195_v58 = vmul.f32 %v5135_v10, %v2191_v35  ;;  %v2753_v1 = vmax.f32 %v5068_v57, %v5121_v2 }
 0x2a5   : > { %v5148_v59 = vpop.eup %3787  ;;  %3801 = vrcp.f32 %v2142_v15  ;;  %v2755_v33 = vmax.f32 %v2751_v29, %v2620_v40  ;;  %v2223_v4 = vmul.f32 %v5135_v10, %v2219_v6  ;;  %v2165_v30 = vmul.f32 %v5127_v14, %v5044_v50 }
 0x2a6   : > { %v5151_v37 = vpop.eup %3789  ;;  %v2816_v55 = vadd.f32 %v5140_v48, %v2812_v8  ;;  %3803 = vpow2.f32 %v2797_v47  ;;  %2176 = vrot.lane.b32.xlu1 %v2167_v49, %s3979_s23  ;;  %1557 = vrot.lane.b32.xlu0 %v1547_v38, %s3981_s24  ;;  %v5184_v8 = vld [vmem:[%s4129_s8 + $0x70] sm:$0xff]  ;;  %v2193_v50 = vmul.f32 %v5127_v14, %v5053_v17  ;;  %v2221_v29 = vmul.f32 %v5127_v14, %v5061_v27 }
 0x2a7   : > { %v5155_v24 = vpop.eup %3791  ;;  %3805 = vpow2.f32 %v2809_v54  ;;  %v2169_v54 = vmul.f32 %v5184_v8, %v2165_v30 }
 0x2a8   : > { %v2820_v25 = vadd.f32 %v5148_v59, %v2816_v55  ;;  %v2136_v32 = vadd.f32 %v5155_v24, %v5151_v37  ;;  %v2626_v7 = vpop.xlane.xlu0 %2625  ;;  %v5164_v23 = vpop.eup %3793 }
 0x2a9   : > { %v5170_v12 = vpop.eup %3795  ;;  %v2757_v41 = vmax.f32 %v2753_v1, %v2626_v7 }
 0x2aa   : > { %v2140_v28 = vadd.f32 %v5164_v23, %v2136_v32  ;;  %2204 = vrot.lane.b32.xlu1 %v2195_v58, %s3980_s21  ;;  %3807 = vrcp.f32 %v2820_v25 }
 0x2ac   : > { %v2144_v36 = vadd.f32 %v5170_v12, %v2140_v28  ;;  %v2741_v11 = vpop.xlane.xlu0 %2740 }
 0x2ad   : > { %v2759_v21 = vmax.f32 %v2755_v33, %v2741_v11 }
 0x2ae   : > { %3809 = vrcp.f32 %v2144_v36  ;;  %2232 = vrot.lane.b32.xlu1 %v2223_v4, %s3981_s24  ;;  %v2197_v4 = vmul.f32 %v5184_v8, %v2193_v50 }
 0x2af   : > { %v2763_v9 = vsub.f32 %v5055_v56, %v2759_v21  ;;  %v2775_v47 = vsub.f32 %v5095_v26, %v2759_v21  ;;  %v2787_v15 = vsub.f32 %v2620_v40, %v2759_v21  ;;  %v2799_v49 = vsub.f32 %v2741_v11, %v2759_v21 }
 0x2b0   : > { %v5181_v35 = vpop.eup %3797  ;;  %v2747_v38 = vpop.xlane.xlu0 %2746 }
 0x2b1   : > { %v5189_v55 = vpop.eup %3799  ;;  %v2767_v6 = vmul.f32 1.442695, %v2763_v9  ;;  %v2779_v25 = vmul.f32 1.442695, %v2775_v47  ;;  %v2791_v32 = vmul.f32 1.442695, %v2787_v15  ;;  %v2761_v56 = vmax.f32 %v2757_v41, %v2747_v38 }
 0x2b2   : > { %v3802_v58 = vpop.eup %3801  ;;  %v2814_v26 = vadd.f32 %v5189_v55, %v5181_v35  ;;  %v2803_v40 = vmul.f32 1.442695, %v2799_v49  ;;  %2180 = vrot.lane.b32.xlu1 %v2169_v54, %s3979_s23  ;;  %v2225_v15 = vmul.f32 %v5184_v8, %v2221_v29 }
 0x2b3   : > { %v5196_v28 = vpop.eup %3803  ;;  %3811 = vpow2.f32 %v2767_v6  ;;  %v2765_v17 = vsub.f32 %v5068_v57, %v2761_v56  ;;  %v2777_v33 = vsub.f32 %v5121_v2, %v2761_v56  ;;  %v2789_v36 = vsub.f32 %v2626_v7, %v2761_v56  ;;  %v5208_v57 = vld [vmem:[%s4129_s8 + $0x10] sm:$0xff] }
 0x2b4   : > { %v2818_v1 = vadd.f32 %v5196_v28, %v2814_v26  ;;  %3813 = vpow2.f32 %v2779_v25  ;;  %v2162_v11 = vmul.f32 %v3802_v58, %v5100_v18  ;;  %v5203_v30 = vpop.eup %3805  ;;  %v2801_v21 = vsub.f32 %v2747_v38, %v2761_v56  ;;  %v5232_v25 = vld [vmem:[%s4129_s8 + $0x50] sm:$0xff] }
 0x2b5   : > { %3815 = vpow2.f32 %v2791_v32  ;;  %v2771_v27 = vmul.f32 1.442695, %v2765_v17  ;;  %v2783_v14 = vmul.f32 1.442695, %v2777_v33  ;;  %v2795_v7 = vmul.f32 1.442695, %v2789_v36 }
 0x2b6   : > { %v2822_v41 = vadd.f32 %v5203_v30, %v2818_v1  ;;  %3817 = vpow2.f32 %v2803_v40  ;;  %2208 = vrot.lane.b32.xlu1 %v2197_v4, %s3980_s21  ;;  %v2166_v2 = vmul.f32 %v5208_v57, %v2162_v11  ;;  %v2190_v9 = vmul.f32 %v3802_v58, %v5107_v22  ;;  %v5242_v40 = vld [vmem:[%s4129_s8 + $0x38] sm:$0xff] }
 0x2b7   : > { %3819 = vpow2.f32 %v2771_v27  ;;  %v5213_v18 = vmul.f32 %v3802_v58, %v5093_v61  ;;  %v5215_v47 = vpop.eup %3807  ;;  %v2807_v49 = vmul.f32 1.442695, %v2801_v21  ;;  %v2218_v38 = vmul.f32 %v3802_v58, %v5114_v19 }
 0x2b8   : > { %3821 = vrcp.f32 %v2822_v41  ;;  %2174 = vrot.lane.b32.xlu0 %v2166_v2, %s3979_s23  ;;  %v2194_v54 = vmul.f32 %v5208_v57, %v2190_v9  ;;  %v5224_v61 = vmul.f32 %v5215_v47, %v5123_v44  ;;  %v2840_v56 = vmul.f32 %v5215_v47, %v5130_v42 }
 0x2b9   : > { %3823 = vpow2.f32 %v2783_v14  ;;  %v2222_v19 = vmul.f32 %v5208_v57, %v2218_v38 }
 0x2ba   : > { %2236 = vrot.lane.b32.xlu1 %v2225_v15, %s3981_s24  ;;  %3825 = vpow2.f32 %v2795_v7  ;;  %v2844_v29 = vmul.f32 %v5242_v40, %v2840_v56 }
 0x2bb   : > { %v3810_v22 = vpop.eup %3809  ;;  %3827 = vpow2.f32 %v2807_v49  ;;  %v822_v49 = vmul.f32 %v4808_v62, %v4824_v3 }
 0x2bc   : > { %2202 = vrot.lane.b32.xlu0 %v2194_v54, %s3980_s21  ;;  %v2164_v50 = vmul.f32 %v3810_v22, %v5155_v24  ;;  %v5229_v6 = vmul.f32 %v3810_v22, %v5151_v37  ;;  %v2192_v44 = vmul.f32 %v3810_v22, %v5164_v23  ;;  %v2220_v33 = vmul.f32 %v3810_v22, %v5170_v12 }
 0x2be   : > { %v2168_v32 = vmul.f32 %v5232_v25, %v2164_v50  ;;  %v2196_v17 = vmul.f32 %v5232_v25, %v2192_v44  ;;  %v2224_v27 = vmul.f32 %v5232_v25, %v2220_v33  ;;  %v5263_v50 = vld [vmem:[%s4129_s8 + $0x18] sm:$0xff] }
 0x2bf   : > { %v5271_v33 = vld [vmem:[%s4129_s8 + $0x58] sm:$0xff] }
 0x2c0   : > { %v3812_v58 = vpop.eup %3811  ;;  %2178 = vrot.lane.b32.xlu1 %v2168_v32, %s3979_s23  ;;  %2230 = vrot.lane.b32.xlu0 %v2222_v19, %s3981_s24 }
 0x2c1   : > { %v3814_v24 = vpop.eup %3813 }
 0x2c2   : > { %v3816_v37 = vpop.eup %3815  ;;  %v2811_v26 = vadd.f32 %v3814_v24, %v3812_v58 }
 0x2c3   : > { %v3818_v36 = vpop.eup %3817 }
 0x2c4   : > { %v3820_v42 = vpop.eup %3819  ;;  %v2815_v1 = vadd.f32 %v3816_v37, %v2811_v26  ;;  %2853 = vrot.lane.b32.xlu1 %v2844_v29, %s3979_s23  ;;  %2206 = vrot.lane.b32.xlu0 %v2196_v17, %s3980_s21 }
 0x2c5   : > { %v5249_v23 = vpop.eup %3821 }
 0x2c6   : > { %v3824_v4 = vpop.eup %3823  ;;  %v2819_v11 = vadd.f32 %v3818_v36, %v2815_v1  ;;  %v5254_v21 = vmul.f32 %v5249_v23, %v5181_v35 }
 0x2c7   : > { %v2813_v14 = vadd.f32 %v3824_v4, %v3820_v42  ;;  %v3826_v12 = vpop.eup %3825 }
 0x2c8   : > { %3829 = vrcp.f32 %v2819_v11  ;;  %2234 = vrot.lane.b32.xlu0 %v2224_v27, %s3981_s24  ;;  %v3828_v2 = vpop.eup %3827 }
 0x2c9   : > { %v2817_v41 = vadd.f32 %v3826_v12, %v2813_v14 }
 0x2cb   : > { %v2821_v7 = vadd.f32 %v3828_v2, %v2817_v41  ;;  %v2868_v41 = vmul.f32 %v5215_v47, %v5140_v48  ;;  %v824_v48 = vmul.f32 %v4898_v51, %v4889_v20  ;;  %v2898_v20 = vmul.f32 %v5249_v23, %v5203_v30 }
 0x2cc   : > { %v1482_v30 = vmul.f32 %v4974_v52, %v4978_v43  ;;  %v1481_v52 = vmul.f32 %v5072_v34, %v5078_v5  ;;  %v2159_v34 = vmul.f32 %v5135_v10, %v5091_v63  ;;  %v2158_v63 = vmul.f32 %v5208_v57, %v5213_v18 }
 0x2cd   : > { %3831 = vrcp.f32 %v2821_v7 }
 0x2d3   : > { %v840_v9 = vpop.permute.xlu1 %839 }
 0x2d4   : > { %v850_v35 = vadd.f32 %v840_v9, %v822_v49 }
 0x2d5   : > { %v3830_v15 = vpop.eup %3829 }
 0x2d6   : > { %v2839_v54 = vmul.f32 %v3830_v15, %v3814_v24  ;;  %v5259_v38 = vmul.f32 %v3830_v15, %v3812_v58  ;;  %v2867_v19 = vmul.f32 %v3830_v15, %v3816_v37  ;;  %v2842_v37 = vmul.f32 %v5249_v23, %v5189_v55 }
 0x2d7   : > { %v868_v22 = vpop.permute.xlu1 %867  ;;  %v2895_v27 = vmul.f32 %v3830_v15, %v3818_v36  ;;  %v2872_v15 = vmul.f32 %v5242_v40, %v2868_v41 }
 0x2d8   : > { %v2843_v32 = vmul.f32 %v5263_v50, %v2839_v54  ;;  %v878_v44 = vadd.f32 %v868_v22, %v850_v35  ;;  %v2871_v58 = vmul.f32 %v5263_v50, %v2867_v19  ;;  %v2870_v54 = vmul.f32 %v5249_v23, %v5196_v28 }
 0x2da   : > { %v3832_v56 = vpop.eup %3831  ;;  %2851 = vrot.lane.b32.xlu0 %v2843_v32, %s3979_s23  ;;  %v2896_v32 = vmul.f32 %v5215_v47, %v5148_v59  ;;  %v823_v59 = vmul.f32 %v4943_v60, %v4967_v13 }
 0x2db   : > { %v896_v26 = vpop.permute.xlu1 %895  ;;  %v2841_v29 = vmul.f32 %v3832_v56, %v3824_v4  ;;  %v5267_v17 = vmul.f32 %v3832_v56, %v3820_v42  ;;  %v2869_v24 = vmul.f32 %v3832_v56, %v3826_v12  ;;  %v821_v42 = vmul.f32 %v4854_v39, %v4867_v53  ;;  %v5286_v12 = vld [vmem:[%s4129_s8 + $0x78] sm:$0xff]  ;;  %s3903_s8 = scalar_lea.vmem %s5375_s20, 512 }
 0x2dc   : > { %v906_v62 = vadd.f32 %v896_v26, %v878_v44  ;;  %v838_v3 = vpop.permute.xlu0 %837  ;;  %v2846_v55 = vmul.f32 %v5286_v12, %v2842_v37  ;;  %v2899_v53 = vmul.f32 %v5263_v50, %v2895_v27  ;;  %v2897_v9 = vmul.f32 %v3832_v56, %v3828_v2  ;;  %p3904_p3 = scmp.ne.s32.totalorder %s5375_s20, %s3903_s8 }
 0x2dd   : > { %v2845_v1 = vmul.f32 %v5271_v33, %v2841_v29  ;;  %v2873_v11 = vmul.f32 %v5271_v33, %v2869_v24  ;;  %v849_v14 = vadd.f32 %v838_v3, %v821_v42  ;;  %v2874_v35 = vmul.f32 %v5286_v12, %v2870_v54 }
 0x2de   : > { %910 = vst.msk [vmem:[%s5276_s13 + $0x8] sm:$0xff] %vm250_vm0, %v906_v62  ;;  %2879 = vrot.lane.b32.xlu0 %v2871_v58, %s3980_s21  ;;  %v2901_v22 = vmul.f32 %v5271_v33, %v2897_v9  ;;  %v2900_v44 = vmul.f32 %v5242_v40, %v2896_v32  ;;  %v2902_v29 = vmul.f32 %v5286_v12, %v2898_v20  ;;  %p3905_p7 = pnand %p3904_p3, %p5438_p10 }
 0x2df   : > { %2855 = vrot.lane.b32.xlu1 %v2845_v1, %s3979_s23 }
 0x2e0   : > { %v866_v4 = vpop.permute.xlu0 %865  ;;  %p3906_p11 = pneg %p3905_p7 }
 0x2e1   : > { %v877_v7 = vadd.f32 %v866_v4, %v849_v14 }
 0x2e2   : > { %2883 = vrot.lane.b32.xlu0 %v2873_v11, %s3980_s21  ;;  %v1484_v11 = vmul.f32 %v5041_v45, %v5003_v0 }
 0x2e3   : > { %2857 = vrot.lane.b32.xlu1 %v2846_v55, %s3979_s23 }
 0x2e4   : > { %v894_v39 = vpop.permute.xlu0 %893 }
 0x2e5   : > { %v844_v49 = vpop.permute.xlu1 %843  ;;  %v905_v36 = vadd.f32 %v894_v39, %v877_v7 }
 0x2e6   : > { %2907 = vrot.lane.b32.xlu0 %v2899_v53, %s3981_s24  ;;  %v852_v19 = vadd.f32 %v844_v49, %v824_v48 }
 0x2e7   : > { %909 = vst.msk [vmem:[%s5276_s13] sm:$0xff] %vm250_vm0, %v905_v36  ;;  %2881 = vrot.lane.b32.xlu1 %v2872_v15, %s3980_s21  ;;  %v1483_v15 = vmul.f32 %v5117_v31, %v5105_v16  ;;  %v2161_v31 = vmul.f32 %v5184_v8, %v5146_v46  ;;  %v2160_v46 = vmul.f32 %v5232_v25, %v5229_v6 }
 0x2e8   : > { %v2837_v6 = vmul.f32 %v5271_v33, %v5267_v17  ;;  %v2838_v17 = vmul.f32 %v5286_v12, %v5254_v21 }
 0x2e9   : > { %v872_v2 = vpop.permute.xlu1 %871 }
 0x2ea   : > { %2911 = vrot.lane.b32.xlu0 %v2901_v22, %s3981_s24  ;;  %v880_v28 = vadd.f32 %v872_v2, %v852_v19 }
 0x2eb   : > { %2885 = vrot.lane.b32.xlu1 %v2874_v35, %s3980_s21 }
 0x2ec   : > { %v870_v26 = vpop.permute.xlu0 %869 }
 0x2ed   : > { %v900_v56 = vpop.permute.xlu1 %899 }
 0x2ee   : > { %v908_v51 = vadd.f32 %v900_v56, %v880_v28 }
 0x2ef   : > { %2909 = vrot.lane.b32.xlu1 %v2900_v44, %s3981_s24 }
 0x2f0   : > { %912 = vst.msk [vmem:[%s5276_s13 + $0x18] sm:$0xff] %vm250_vm0, %v908_v51  ;;  %v898_v58 = vpop.permute.xlu0 %897 }
 0x2f1   : > { %v842_v47 = vpop.permute.xlu1 %841 }
 0x2f2   : > { %v851_v62 = vadd.f32 %v842_v47, %v823_v59 }
 0x2f3   : > { %2913 = vrot.lane.b32.xlu1 %v2902_v29, %s3981_s24 }
 0x2f4   : > { %v879_v3 = vadd.f32 %v870_v26, %v851_v62 }
 0x2f5   : > { %v1500_v24 = vpop.permute.xlu1 %1499 }
 0x2f6   : > { %v907_v1 = vadd.f32 %v898_v58, %v879_v3  ;;  %v1510_v37 = vadd.f32 %v1500_v24, %v1482_v30 }
 0x2f8   : > { %911 = vst.msk [vmem:[%s5276_s13 + $0x10] sm:$0xff] %vm250_vm0, %v907_v1 }
 0x2f9   : > { %v1528_v23 = vpop.permute.xlu1 %1527 }
 0x2fa   : > { %v1538_v42 = vadd.f32 %v1528_v23, %v1510_v37 }
 0x2fd   : > { %v1556_v4 = vpop.permute.xlu1 %1555 }
 0x2fe   : > { %v1566_v60 = vadd.f32 %v1556_v4, %v1538_v42 }
 0x300   : > { %1575 = vrot.lane.b32.xlu1 %v1566_v60, %s3981_s24  ;;  %v2835_v60 = vmul.f32 %v5263_v50, %v5259_v38 }
 0x301   : > { %v1504_v13 = vpop.permute.xlu1 %1503 }
 0x302   : > { %v1512_v14 = vadd.f32 %v1504_v13, %v1484_v11 }
 0x305   : > { %v1532_v27 = vpop.permute.xlu1 %1531 }
 0x306   : > { %v1540_v55 = vadd.f32 %v1532_v27, %v1512_v14 }
 0x308   : > { %v1498_v41 = vpop.permute.xlu0 %1497 }
 0x309   : > { %v1560_v7 = vpop.permute.xlu1 %1559  ;;  %v1509_v53 = vadd.f32 %v1498_v41, %v1481_v52  ;;  %v2836_v52 = vmul.f32 %v5242_v40, %v5224_v61 }
 0x30a   : > { %v1568_v39 = vadd.f32 %v1560_v7, %v1540_v55 }
 0x30c   : > { %1579 = vrot.lane.b32.xlu1 %v1568_v39, %s3981_s24  ;;  %v1526_v43 = vpop.permute.xlu0 %1525 }
 0x30d   : > { %v1537_v9 = vadd.f32 %v1526_v43, %v1509_v53 }
 0x310   : > { %v1554_v49 = vpop.permute.xlu0 %1553 }
 0x311   : > { %v1565_v36 = vadd.f32 %v1554_v49, %v1537_v9 }
 0x313   : > { %1573 = vrot.lane.b32.xlu0 %v1565_v36, %s3981_s24 }
 0x314   : > { %v1502_v0 = vpop.permute.xlu1 %1501  ;;  %v1530_v54 = vpop.permute.xlu0 %1529 }
 0x315   : > { %v1511_v45 = vadd.f32 %v1502_v0, %v1483_v15 }
 0x317   : > { %v1539_v48 = vadd.f32 %v1530_v54, %v1511_v45 }
 0x318   : > { %v2177_v22 = vpop.permute.xlu1 %2176  ;;  %v1558_v2 = vpop.permute.xlu0 %1557 }
 0x319   : > { %v1567_v35 = vadd.f32 %v1558_v2, %v1539_v48  ;;  %v2187_v32 = vadd.f32 %v2177_v22, %v2159_v34 }
 0x31b   : > { %1577 = vrot.lane.b32.xlu0 %v1567_v35, %s3981_s24 }
 0x31c   : > { %v2205_v5 = vpop.permute.xlu1 %2204 }
 0x31d   : > { %v2215_v19 = vadd.f32 %v2205_v5, %v2187_v32 }
 0x320   : > { %v2233_v28 = vpop.permute.xlu1 %2232 }
 0x321   : > { %v2243_v56 = vadd.f32 %v2233_v28, %v2215_v19 }
 0x323   : > { %2252 = vrot.lane.b32.xlu1 %v2243_v56, %s3980_s21 }
 0x324   : > { %v2181_v16 = vpop.permute.xlu1 %2180 }
 0x325   : > { %v2189_v20 = vadd.f32 %v2181_v16, %v2161_v31 }
 0x328   : > { %v2209_v44 = vpop.permute.xlu1 %2208 }
 0x329   : > { %v2217_v26 = vadd.f32 %v2209_v44, %v2189_v20 }
 0x32a   : > { %v2175_v51 = vpop.permute.xlu0 %2174 }
 0x32b   : > { %v2186_v29 = vadd.f32 %v2175_v51, %v2158_v63 }
 0x32c   : > { %v2237_v59 = vpop.permute.xlu1 %2236 }
 0x32d   : > { %v2245_v47 = vadd.f32 %v2237_v59, %v2217_v26 }
 0x32e   : > { %v2203_v10 = vpop.permute.xlu0 %2202 }
 0x32f   : > { %2256 = vrot.lane.b32.xlu1 %v2245_v47, %s3980_s21  ;;  %v2214_v62 = vadd.f32 %v2203_v10, %v2186_v29 }
 0x332   : > { %v2231_v3 = vpop.permute.xlu0 %2230  ;;  %v2179_v24 = vpop.permute.xlu1 %2178 }
 0x333   : > { %v2242_v58 = vadd.f32 %v2231_v3, %v2214_v62  ;;  %v2188_v1 = vadd.f32 %v2179_v24, %v2160_v46 }
 0x335   : > { %2250 = vrot.lane.b32.xlu0 %v2242_v58, %s3980_s21 }
 0x336   : > { %v2207_v8 = vpop.permute.xlu0 %2206  ;;  %v2854_v18 = vpop.permute.xlu1 %2853 }
 0x337   : > { %v2216_v30 = vadd.f32 %v2207_v8, %v2188_v1  ;;  %v2864_v50 = vadd.f32 %v2854_v18, %v2836_v52 }
 0x33a   : > { %v2235_v23 = vpop.permute.xlu0 %2234 }
 0x33b   : > { %v2244_v37 = vadd.f32 %v2235_v23, %v2216_v30 }
 0x33d   : > { %2254 = vrot.lane.b32.xlu0 %v2244_v37, %s3980_s21 }
 0x34c   : > { %v2852_v57 = vpop.permute.xlu0 %2851 }
 0x34d   : > { %v2863_v11 = vadd.f32 %v2852_v57, %v2835_v60 }
 0x350   : > { %v2880_v42 = vpop.permute.xlu0 %2879 }
 0x351   : > { %v2856_v4 = vpop.permute.xlu1 %2855  ;;  %v2891_v25 = vadd.f32 %v2880_v42, %v2863_v11 }
 0x352   : > { %v2865_v55 = vadd.f32 %v2856_v4, %v2837_v6 }
 0x354   : > { %v2884_v13 = vpop.permute.xlu0 %2883 }
 0x355   : > { %v2858_v27 = vpop.permute.xlu1 %2857  ;;  %v2893_v39 = vadd.f32 %v2884_v13, %v2865_v55 }
 0x356   : > { %v2866_v49 = vadd.f32 %v2858_v27, %v2838_v17 }
 0x358   : > { %v2908_v14 = vpop.permute.xlu0 %2907 }
 0x359   : > { %v2882_v41 = vpop.permute.xlu1 %2881  ;;  %v2919_v7 = vadd.f32 %v2908_v14, %v2891_v25 }
 0x35a   : > { %v2892_v33 = vadd.f32 %v2882_v41, %v2864_v50 }
 0x35b   : > { %2927 = vrot.lane.b32.xlu0 %v2919_v7, %s3979_s23 }
 0x35c   : > { %v2912_v43 = vpop.permute.xlu0 %2911 }
 0x35d   : > { %v2886_v53 = vpop.permute.xlu1 %2885  ;;  %v2921_v38 = vadd.f32 %v2912_v43, %v2893_v39 }
 0x35e   : > { %v2894_v15 = vadd.f32 %v2886_v53, %v2866_v49 }
 0x35f   : > { %2931 = vrot.lane.b32.xlu0 %v2921_v38, %s3979_s23 }
 0x361   : > { %v2910_v9 = vpop.permute.xlu1 %2909 }
 0x362   : > { %v2920_v36 = vadd.f32 %v2910_v9, %v2892_v33 }
 0x364   : > { %2929 = vrot.lane.b32.xlu1 %v2920_v36, %s3979_s23 }
 0x365   : > { %v2914_v61 = vpop.permute.xlu1 %2913 }
 0x366   : > { %v2922_v40 = vadd.f32 %v2914_v61, %v2894_v15 }
 0x368   : > { %2933 = vrot.lane.b32.xlu1 %v2922_v40, %s3979_s23  ;;  %s3907_s23 = sshll.u32 %s3982_s19, 4  ;;  %s3908_s23 = int_to_ptr.vmem [resolvable:$false] %s3907_s23 }
 0x369   : > { %s3909_s21 = scalar_lea.vmem %s3908_s23, 1024  ;;  %p3910_p12 = scmp.lt.s32.totalorder %s5375_s20, %s3908_s23 }
 0x36a   : > { %p3911_p2 = scmp.lt.s32.totalorder %s3909_s21, %s3903_s8 }
 0x36c   : > { %p3912_p13 = por %p3911_p2, %p3910_p12 }
 0x36e   : > { %p3913_p0 = pnand %p3912_p13, %p3906_p11 }
 0x372   : > { %v1576_v0 = vpop.permute.xlu1 %1575 }
 0x373   : > { %1587 = vst.msk [vmem:[%s5276_s13 + $0x8] sm:$0xff] %vm1585_vm1, %v1576_v0 }
 0x37e   : > { %v1580_v21 = vpop.permute.xlu1 %1579 }
 0x37f   : > { %1589 = vst.msk [vmem:[%s5276_s13 + $0x18] sm:$0xff] %vm1585_vm1, %v1580_v21 }
 0x385   : > { %v1574_v12 = vpop.permute.xlu0 %1573 }
 0x386   : > { %1586 = vst.msk [vmem:[%s5276_s13] sm:$0xff] %vm1585_vm1, %v1574_v12 }
 0x38d   : > { %v1578_v45 = vpop.permute.xlu0 %1577 }
 0x38e   : > { %1588 = vst.msk [vmem:[%s5276_s13 + $0x10] sm:$0xff] %vm1585_vm1, %v1578_v45 }
 0x395   : > { %v2253_v54 = vpop.permute.xlu1 %2252 }
 0x396   : > { %2264 = vst.msk [vmem:[%s5276_s13 + $0x8] sm:$0xff] %vm2262_vm2, %v2253_v54 }
 0x3a1   : > { %v2257_v48 = vpop.permute.xlu1 %2256 }
 0x3a2   : > { %2266 = vst.msk [vmem:[%s5276_s13 + $0x18] sm:$0xff] %vm2262_vm2, %v2257_v48 }
 0x3a7   : > { %v2251_v22 = vpop.permute.xlu0 %2250 }
 0x3a8   : > { %2263 = vst.msk [vmem:[%s5276_s13] sm:$0xff] %vm2262_vm2, %v2251_v22 }
 0x3af   : > { %v2255_v2 = vpop.permute.xlu0 %2254 }
 0x3b0   : > { %2265 = vst.msk [vmem:[%s5276_s13 + $0x10] sm:$0xff] %vm2262_vm2, %v2255_v2 }
 0x3cd   : > { %v2928_v35 = vpop.permute.xlu0 %2927 }
 0x3ce   : > { %2940 = vst.msk [vmem:[%s5276_s13] sm:$0xff] %vm2939_vm3, %v2928_v35 }
 0x3d1   : > { %v2932_v34 = vpop.permute.xlu0 %2931 }
 0x3d2   : > { %2942 = vst.msk [vmem:[%s5276_s13 + $0x10] sm:$0xff] %vm2939_vm3, %v2932_v34 }
 0x3d6   : > { %v2930_v5 = vpop.permute.xlu1 %2929 }
 0x3d7   : > { %2941 = vst.msk [vmem:[%s5276_s13 + $0x8] sm:$0xff] %vm2939_vm3, %v2930_v5 }
 0x3da   : > { %v2934_v32 = vpop.permute.xlu1 %2933 }
 0x3db   : > { %2943 = vst.msk [vmem:[%s5276_s13 + $0x18] sm:$0xff] %vm2939_vm3, %v2934_v32 }
 0x3dc   : > { %3916 = shalt.err (!%p3913_p0)
}
 0x3dd   : > { %s3917_s24 = scalar_lea.hbm %s5373_s6, 512  ;;  %s3921_s29 = scalar_lea.hbm %s5422_s4, 4096 }
 0x3de   : > { %p3918_p5 = scmp.ne.s32.totalorder %s5373_s6, %s3917_s24  ;;  %p3922_p4 = scmp.lt.s32.totalorder %s5373_s6, %s5422_s4 }
 0x3df   : > { %p3923_p6 = scmp.lt.s32.totalorder %s3921_s29, %s3917_s24 }
 0x3e0   : > { %p3919_p9 = pnand %p3918_p5, %p5438_p10 }
 0x3e1   : > { %p3924_p8 = por %p3923_p6, %p3922_p4 }
 0x3e2   : > { %p3920_p1 = pneg %p3919_p9 }
 0x3e4   : > { %p3925_p3 = pnand %p3924_p8, %p3920_p1 }
 0x3e6   : > { %3928 = shalt.err (!%p3925_p3)
}
 0x3e7   : > { %s3983_s13 = smov 128   ;;  %s3984_s14 = smov 8  }
 0x3e8   : > { %3485 = dma.vmem_to_hbm [thread:$0]  (%p5438_p10), %s5375_s20, 512, %s5373_s6, %s2945_s7, %s3983_s13, %s3983_s13, %s3984_s14  }
 0x3e9 PF: > { %p3502_p7 = scmp.ge.s32.totalorder %s3971_s18, 2  ;;  %s2973_s25 = sand.u32 1, %s3959_s15  }
 0x3ea   : > { %p5439_p11 = scmp.ne.s32.totalorder %s5428_s22, 0  ;;  %s2974_s30 = scalar_lea.sflag [#allocation4], %s2973_s25 }
 0x3ec   : > { %p3496_p12 = pnand %p3502_p7, %p5439_p11 }
 0x3ee   : > { %p3497_p2 = pneg %p3496_p12 }
 0x3f0   : > { %3954 = dma.done.wait (%p3497_p2), %s2974_s30, 512  }
 0x3f1   : > { %3956 = vsyncadd (%p3497_p2), %s2974_s30, 4294966784  ;;  %p18_p13 = scmp.ge.s32.totalorder %s4063_s27, 10   ;;  %s5440_s15 = smov %s3963_s16 }
 0x3f2   : > { %s5441_s16 = smov %s3967_s17  ;;  %s5442_s17 = smov %s4080_s9 }
 0x3f3   : > { %s5443_s18 = smov %s4063_s27  ;;  %20 = sbr.rel (!%p18_p13) target bundleno = 6 (0x6), region = 85 }
 0x3f8   :  { %2979 = vsyncpa [#allocation3], 1 }
 0x3f9   :  { %2981 = vsyncpa [#allocation3 + $0x1], 1 }
 0x3fa   :  { %2982 = vsyncpa [#allocation6], 1 }
 0x3fb   :  { %2983 = vsyncpa [#allocation4], 1 }
 0x3fc   :  { %2985 = vsyncpa [#allocation4 + $0x1], 1 }

</bundles_post_ra>
